<compile_context>
chip_gen: v7x
topology: tpu7x:2x2x1
jax: 0.10.0
libtpu: 0.0.40
codegen_flags: <defaults>
</compile_context>

<pallas_src>
import functools

import jax
import jax.numpy as jnp
from jax.experimental import pallas as pl
from jax.experimental.pallas import tpu as pltpu

_INV_SQRT2 = 0.7071067811865476


def _gelu(x):
    # exact gelu (erf form), same as torch.nn.GELU()
    return 0.5 * x * (1.0 + jax.lax.erf(x * _INV_SQRT2))


def _ln_lanes(x, gamma, beta, eps=1e-5):
    # LayerNorm over the last (lane) dim.
    mu = jnp.mean(x, axis=-1, keepdims=True)
    xc = x - mu
    var = jnp.mean(xc * xc, axis=-1, keepdims=True)
    return xc * jax.lax.rsqrt(var + eps) * gamma + beta


def _ln_sublanes(x, gamma, beta, eps=1e-5):
    # LayerNorm over axis 0 (sublanes) -- the window axis of the (W, H)-layout stream.
    mu = jnp.mean(x, axis=0, keepdims=True)
    xc = x - mu
    var = jnp.mean(xc * xc, axis=0, keepdims=True)
    return xc * jax.lax.rsqrt(var + eps) * gamma + beta


def dual_mlp_kernel(x1_ref, x2_ref,
                    w1aT_ref, w1bT_ref, wg1T_ref,
                    w2a_ref, w2b_ref, wg2_ref,
                    b1a_ref, b2a_ref, vw_ref, vh_ref,
                    o1_ref, o2_ref, *, bt, w, h):
    f32 = jnp.float32
    bf16 = jnp.bfloat16

    # ---- unpack + hoist parameter broadcasts (done once per grid step) ----------------
    vw = vw_ref[...]            # (W, 6)  columns: [b1b, bg1, g1, be1, g3, be3]
    vh = vh_ref[...]            # (6, H)  rows:    [b2b, bg2, g2, be2, g4, be4]
    col = lambda j: jnp.broadcast_to(vw[:, j:j + 1], (w, h))
    b1b_b, bg1_b, g1_b, be1_b, g3_b, be3_b = (col(j) for j in range(6))
    b2b_r, bg2_r, g2_r, be2_r = vh[0:1], vh[1:2], vh[2:3], vh[3:4]
    g4_b = jnp.broadcast_to(vh[4:5], (w, h))
    be4_b = jnp.broadcast_to(vh[5:6], (w, h))
    b1a_b = jnp.broadcast_to(b1a_ref[...], (2 * w, h))       # (2W, H)
    b2a_r = b2a_ref[...]                                      # (1, 2H)

    # ---- channel-mixing (x2) stream: batch folded into matmul M -----------------------
    x2f = x2_ref[...]                                         # (BT*W, H) f32
    h2 = jnp.dot(x2f.astype(bf16), w2a_ref[...], preferred_element_type=f32) + b2a_r
    h2 = _gelu(h2)                                            # (BT*W, 2H) f32
    h2 = jnp.dot(h2.astype(bf16), w2b_ref[...], preferred_element_type=f32) + b2b_r
    x2a = _ln_lanes(h2 + x2f, g2_r, be2_r)                    # ln2 over hidden_dim
    gate2 = jax.nn.sigmoid(
        jnp.dot(x2a.astype(bf16), wg2_ref[...], preferred_element_type=f32) + bg2_r)
    gat2 = gate2 * x2a                                        # gat2(x2a), (BT*W, H) f32

    w1aT = w1aT_ref[...]        # (2W, W) bf16
    w1bT = w1bT_ref[...]        # (W, 2W) bf16
    wg1T = wg1T_ref[...]        # (W, W)  bf16

    # ---- token-mixing (x1) stream: kept in (W, H) layout -> zero transposes -----------
    # Contraction is over W (differs per batch element), so batch cannot fold into M;
    # use a small static unrolled loop of 2-D dots instead (bt is compile-time constant).
    for b in range(bt):
        r0 = b * w
        t1 = x1_ref[r0:r0 + w, :]                             # (W, H) f32 == x1[b]
        u = jnp.dot(w1aT, t1.astype(bf16), preferred_element_type=f32)    # (2W, H)
        u = _gelu(u + b1a_b)
        v = jnp.dot(w1bT, u.astype(bf16), preferred_element_type=f32)     # (W, H)
        y1a = _ln_sublanes(v + b1b_b + t1, g1_b, be1_b)       # ln1 over window_size
        y1b = _ln_sublanes(y1a + gat2[r0:r0 + w, :], g3_b, be3_b)   # ln3 over window_size
        gate1 = jax.nn.sigmoid(
            jnp.dot(wg1T, y1b.astype(bf16), preferred_element_type=f32) + bg1_b)
        g1v = gate1 * y1b                                     # gat1(x1)^T, (W, H)
        o1_ref[r0:r0 + w, :] = y1b.astype(o1_ref.dtype)       # == x1.transpose(-1,-2)
        x2b = _ln_lanes(x2a[r0:r0 + w, :] + g1v, g4_b, be4_b)  # ln4 over hidden_dim
        o2_ref[r0:r0 + w, :] = x2b.astype(o2_ref.dtype)


def dual_mlp_layer(x1, x2, params, *, block_batch=None):
    B, W, H = x1.shape
    assert x2.shape == (B, W, H)

    if block_batch is None:
        # Largest divisor of B with block_batch*W <= 512 rows, preferring >= 2 grid steps
        # so both v7x TensorCores get work.
        cands = [d for d in range(1, B + 1) if B % d == 0 and d * W <= 512]
        multi = [d for d in cands if B // d >= 2]
        block_batch = max(multi) if multi else max(cands)
    assert B % block_batch == 0
    grid = (B // block_batch,)
    rows = block_batch * W

    # Flatten (B, W, H) -> (B*W, H): free leading-dim merge, done by XLA outside the kernel.
    x1f = x1.reshape(B * W, H)
    x2f = x2.reshape(B * W, H)

    bf16 = jnp.bfloat16
    # Token-mixing weights pre-transposed once here so every in-kernel matmul is a plain
    # jnp.dot (no in-kernel transposes); all MXU weight operands are stored bf16.
    weights = (
        params["w1a"].T.astype(bf16),   # (2W, W)
        params["w1b"].T.astype(bf16),   # (W, 2W)
        params["wg1"].T.astype(bf16),   # (W, W)
        params["w2a"].astype(bf16),     # (H, 2H)
        params["w2b"].astype(bf16),     # (2H, H)
        params["wg2"].astype(bf16),     # (H, H)
    )
    smalls = (params["b1a"], params["b2a"], params["vw"], params["vh"])

    row_spec = pl.BlockSpec((rows, H), lambda i: (i, 0))
    # Constant params: block index never changes across the grid so Pallas only fetches
    # them once.  (pipeline_mode=pl.Buffered(1) would also drop their second VMEM buffer;
    # skipped here since the parameter footprint is tiny.)
    const_spec = lambda a: pl.BlockSpec(a.shape, lambda i: (0, 0))

    kernel = functools.partial(dual_mlp_kernel, bt=block_batch, w=W, h=H)
    o1, o2 = pl.pallas_call(
        kernel,
        grid=grid,
        in_specs=[row_spec, row_spec] + [const_spec(a) for a in (*weights, *smalls)],
        out_specs=[row_spec, row_spec],
        out_shape=(jax.ShapeDtypeStruct((B * W, H), x1.dtype),
                   jax.ShapeDtypeStruct((B * W, H), x2.dtype)),
        compiler_params=pltpu.CompilerParams(dimension_semantics=("parallel",)),
    )(x1f, x2f, *weights, *smalls)
    return o1.reshape(B, W, H), o2.reshape(B, W, H)


def reference(x1, x2, params):
    # Pure-JAX f32 reference matching the PyTorch forward exactly.
    b1a = params["b1a"][:, 0]
    b2a = params["b2a"][0]
    b1b, bg1, g1, be1, g3, be3 = (params["vw"][:, j] for j in range(6))
    b2b, bg2, g2, be2, g4, be4 = (params["vh"][j] for j in range(6))

    def ln(x, g, b, eps=1e-5):
        mu = jnp.mean(x, axis=-1, keepdims=True)
        var = jnp.mean((x - mu) ** 2, axis=-1, keepdims=True)
        return (x - mu) * jax.lax.rsqrt(var + eps) * g + b

    x1t = jnp.swapaxes(x1, -1, -2)
    h1 = jax.nn.gelu(x1t @ params["w1a"] + b1a, approximate=False) @ params["w1b"] + b1b
    x1a = ln(h1 + x1t, g1, be1)
    h2 = jax.nn.gelu(x2 @ params["w2a"] + b2a, approximate=False) @ params["w2b"] + b2b
    x2a = ln(h2 + x2, g2, be2)
    gat2 = jax.nn.sigmoid(x2a @ params["wg2"] + bg2) * x2a
    x1b = ln(x1a + jnp.swapaxes(gat2, -1, -2), g3, be3)
    gat1 = jax.nn.sigmoid(x1b @ params["wg1"] + bg1) * x1b
    x2b = ln(x2a + jnp.swapaxes(gat1, -1, -2), g4, be4)
    return jnp.swapaxes(x1b, -1, -2), x2b


def make_params(key, window_size, hidden_dim, dtype=jnp.float32):
    W, H = window_size, hidden_dim
    ks = jax.random.split(key, 20)
    n = lambda k, shape, s: jax.random.normal(k, shape, dtype) * s
    b1b, bg1 = n(ks[6], (W,), 0.1), n(ks[7], (W,), 0.1)
    g1, be1 = 1.0 + n(ks[8], (W,), 0.1), n(ks[9], (W,), 0.1)
    g3, be3 = 1.0 + n(ks[10], (W,), 0.1), n(ks[11], (W,), 0.1)
    b2b, bg2 = n(ks[12], (H,), 0.1), n(ks[13], (H,), 0.1)
    g2, be2 = 1.0 + n(ks[14], (H,), 0.1), n(ks[15], (H,), 0.1)
    g4, be4 = 1.0 + n(ks[16], (H,), 0.1), n(ks[17], (H,), 0.1)
    return {
        # Linear weights stored (in_features, out_features), i.e. nn.Linear weight.T.
        "w1a": n(ks[0], (W, 2 * W), 0.05),
        "w1b": n(ks[1], (2 * W, W), 0.05),
        "wg1": n(ks[2], (W, W), 0.05),
        "w2a": n(ks[3], (H, 2 * H), 0.05),
        "w2b": n(ks[4], (2 * H, H), 0.05),
        "wg2": n(ks[5], (H, H), 0.05),
        "b1a": n(ks[18], (2 * W, 1), 0.1),      # block1 lin1 bias, stored as a column
        "b2a": n(ks[19], (1, 2 * H), 0.1),      # block2 lin1 bias, stored as a row
        "vw": jnp.stack([b1b, bg1, g1, be1, g3, be3], axis=1),   # (W, 6) packed W-vectors
        "vh": jnp.stack([b2b, bg2, g2, be2, g4, be4], axis=0),   # (6, H) packed H-vectors
    }


if __name__ == "__main__":
    B, W, H = 8, 8, 32          # batch, window_size, hidden_dim
    key = jax.random.PRNGKey(0)
    k1, k2, kp = jax.random.split(key, 3)
    x1 = jax.random.normal(k1, (B, W, H), jnp.float32)
    x2 = jax.random.normal(k2, (B, W, H), jnp.float32)
    params = make_params(kp, W, H)

    out1, out2 = dual_mlp_layer(x1, x2, params)
    out1, out2 = jax.block_until_ready((out1, out2))

    ref1, ref2 = reference(x1, x2, params)
    # bf16 MXU operands with f32 accumulation -> compare against the exact-f32 reference
    # with bf16-appropriate tolerances (review: expect ~1e-2 instead of 1e-4).
    assert jnp.allclose(out1, ref1, atol=3e-2, rtol=3e-2), float(jnp.max(jnp.abs(out1 - ref1)))
    assert jnp.allclose(out2, ref2, atol=3e-2, rtol=3e-2), float(jnp.max(jnp.abs(out2 - ref2)))

    print("KERNEL_OK")
</pallas_src>

<mosaic_0001>
module attributes {stable_mosaic.version = 11 : i64} {
  func.func @dual_mlp_kernel(%arg0: i32, %arg1: memref<32x32xf32, #tpu.memory_space<vmem>>, %arg2: memref<32x32xf32, #tpu.memory_space<vmem>>, %arg3: memref<16x8xbf16, #tpu.memory_space<vmem>>, %arg4: memref<8x16xbf16, #tpu.memory_space<vmem>>, %arg5: memref<8x8xbf16, #tpu.memory_space<vmem>>, %arg6: memref<32x64xbf16, #tpu.memory_space<vmem>>, %arg7: memref<64x32xbf16, #tpu.memory_space<vmem>>, %arg8: memref<32x32xbf16, #tpu.memory_space<vmem>>, %arg9: memref<16x1xf32, #tpu.memory_space<vmem>>, %arg10: memref<1x64xf32, #tpu.memory_space<vmem>>, %arg11: memref<8x6xf32, #tpu.memory_space<vmem>>, %arg12: memref<6x32xf32, #tpu.memory_space<vmem>>, %arg13: memref<32x32xf32, #tpu.memory_space<vmem>>, %arg14: memref<32x32xf32, #tpu.memory_space<vmem>>) attributes {dimension_semantics = [#tpu.dimension_semantics<parallel>], iteration_bounds = array<i64: 2>, scalar_prefetch = 0 : i64, scratch_operands = 0 : i64, tpu.core_type = #tpu.core_type<tc>, window_params = [{transform_indices = @transform_0, window_bounds = array<i64: 32, 32>}, {transform_indices = @transform_1, window_bounds = array<i64: 32, 32>}, {pipeline_mode = #tpu.pipeline_mode<synchronous>, transform_indices = @transform_2, window_bounds = array<i64: 16, 8>}, {pipeline_mode = #tpu.pipeline_mode<synchronous>, transform_indices = @transform_3, window_bounds = array<i64: 8, 16>}, {pipeline_mode = #tpu.pipeline_mode<synchronous>, transform_indices = @transform_4, window_bounds = array<i64: 8, 8>}, {pipeline_mode = #tpu.pipeline_mode<synchronous>, transform_indices = @transform_5, window_bounds = array<i64: 32, 64>}, {pipeline_mode = #tpu.pipeline_mode<synchronous>, transform_indices = @transform_6, window_bounds = array<i64: 64, 32>}, {pipeline_mode = #tpu.pipeline_mode<synchronous>, transform_indices = @transform_7, window_bounds = array<i64: 32, 32>}, {pipeline_mode = #tpu.pipeline_mode<synchronous>, transform_indices = @transform_8, window_bounds = array<i64: 16, 1>}, {pipeline_mode = #tpu.pipeline_mode<synchronous>, transform_indices = @transform_9, window_bounds = array<i64: 1, 64>}, {pipeline_mode = #tpu.pipeline_mode<synchronous>, transform_indices = @transform_10, window_bounds = array<i64: 8, 6>}, {pipeline_mode = #tpu.pipeline_mode<synchronous>, transform_indices = @transform_11, window_bounds = array<i64: 6, 32>}, {transform_indices = @transform_12, window_bounds = array<i64: 32, 32>}, {transform_indices = @transform_13, window_bounds = array<i64: 32, 32>}]} {
    %c0 = arith.constant 0 : index
    %c0_0 = arith.constant 0 : index
    %0 = vector.load %arg11[%c0, %c0_0] : memref<8x6xf32, #tpu.memory_space<vmem>>, vector<8x6xf32>
    %c0_1 = arith.constant 0 : index
    %c0_2 = arith.constant 0 : index
    %1 = vector.load %arg12[%c0_1, %c0_2] : memref<6x32xf32, #tpu.memory_space<vmem>>, vector<6x32xf32>
    %2 = vector.extract_strided_slice %0 {offsets = [0, 0], sizes = [8, 1], strides = [1, 1]} : vector<8x6xf32> to vector<8x1xf32>
    %3 = vector.shape_cast %2 : vector<8x1xf32> to vector<8x1xf32>
    %4 = vector.broadcast %3 : vector<8x1xf32> to vector<8x32xf32>
    %5 = vector.extract_strided_slice %0 {offsets = [0, 1], sizes = [8, 1], strides = [1, 1]} : vector<8x6xf32> to vector<8x1xf32>
    %6 = vector.shape_cast %5 : vector<8x1xf32> to vector<8x1xf32>
    %7 = vector.broadcast %6 : vector<8x1xf32> to vector<8x32xf32>
    %8 = vector.extract_strided_slice %0 {offsets = [0, 2], sizes = [8, 1], strides = [1, 1]} : vector<8x6xf32> to vector<8x1xf32>
    %9 = vector.shape_cast %8 : vector<8x1xf32> to vector<8x1xf32>
    %10 = vector.broadcast %9 : vector<8x1xf32> to vector<8x32xf32>
    %11 = vector.extract_strided_slice %0 {offsets = [0, 3], sizes = [8, 1], strides = [1, 1]} : vector<8x6xf32> to vector<8x1xf32>
    %12 = vector.shape_cast %11 : vector<8x1xf32> to vector<8x1xf32>
    %13 = vector.broadcast %12 : vector<8x1xf32> to vector<8x32xf32>
    %14 = vector.extract_strided_slice %0 {offsets = [0, 4], sizes = [8, 1], strides = [1, 1]} : vector<8x6xf32> to vector<8x1xf32>
    %15 = vector.shape_cast %14 : vector<8x1xf32> to vector<8x1xf32>
    %16 = vector.broadcast %15 : vector<8x1xf32> to vector<8x32xf32>
    %17 = vector.extract_strided_slice %0 {offsets = [0, 5], sizes = [8, 1], strides = [1, 1]} : vector<8x6xf32> to vector<8x1xf32>
    %18 = vector.shape_cast %17 : vector<8x1xf32> to vector<8x1xf32>
    %19 = vector.broadcast %18 : vector<8x1xf32> to vector<8x32xf32>
    %20 = vector.extract_strided_slice %1 {offsets = [0, 0], sizes = [1, 32], strides = [1, 1]} : vector<6x32xf32> to vector<1x32xf32>
    %21 = vector.extract_strided_slice %1 {offsets = [1, 0], sizes = [1, 32], strides = [1, 1]} : vector<6x32xf32> to vector<1x32xf32>
    %22 = vector.extract_strided_slice %1 {offsets = [2, 0], sizes = [1, 32], strides = [1, 1]} : vector<6x32xf32> to vector<1x32xf32>
    %23 = vector.extract_strided_slice %1 {offsets = [3, 0], sizes = [1, 32], strides = [1, 1]} : vector<6x32xf32> to vector<1x32xf32>
    %24 = vector.extract_strided_slice %1 {offsets = [4, 0], sizes = [1, 32], strides = [1, 1]} : vector<6x32xf32> to vector<1x32xf32>
    %25 = vector.shape_cast %24 : vector<1x32xf32> to vector<1x32xf32>
    %26 = vector.broadcast %25 : vector<1x32xf32> to vector<8x32xf32>
    %27 = vector.extract_strided_slice %1 {offsets = [5, 0], sizes = [1, 32], strides = [1, 1]} : vector<6x32xf32> to vector<1x32xf32>
    %28 = vector.shape_cast %27 : vector<1x32xf32> to vector<1x32xf32>
    %29 = vector.broadcast %28 : vector<1x32xf32> to vector<8x32xf32>
    %c0_3 = arith.constant 0 : index
    %c0_4 = arith.constant 0 : index
    %30 = vector.load %arg9[%c0_3, %c0_4] : memref<16x1xf32, #tpu.memory_space<vmem>>, vector<16x1xf32>
    %31 = vector.shape_cast %30 : vector<16x1xf32> to vector<16x1xf32>
    %32 = vector.broadcast %31 : vector<16x1xf32> to vector<16x32xf32>
    %c0_5 = arith.constant 0 : index
    %c0_6 = arith.constant 0 : index
    %33 = vector.load %arg10[%c0_5, %c0_6] : memref<1x64xf32, #tpu.memory_space<vmem>>, vector<1x64xf32>
    %c0_7 = arith.constant 0 : index
    %c0_8 = arith.constant 0 : index
    %34 = vector.load %arg2[%c0_7, %c0_8] : memref<32x32xf32, #tpu.memory_space<vmem>>, vector<32x32xf32>
    %35 = arith.truncf %34 : vector<32x32xf32> to vector<32x32xbf16>
    %c0_9 = arith.constant 0 : index
    %c0_10 = arith.constant 0 : index
    %36 = vector.load %arg6[%c0_9, %c0_10] : memref<32x64xbf16, #tpu.memory_space<vmem>>, vector<32x64xbf16>
    %cst = arith.constant dense<0.000000e+00> : vector<32x64xf32>
    %37 = tpu.matmul %35, %36, %cst {dimension_numbers = #tpu.dot_dimension_numbers<[1], [0], [0], [1], [0, 0, 1, 1], [], []>} : vector<32x32xbf16>, vector<32x64xbf16>, vector<32x64xf32> -> vector<32x64xf32>
    %38 = vector.broadcast %33 : vector<1x64xf32> to vector<32x64xf32>
    %39 = arith.addf %37, %38 : vector<32x64xf32>
    %cst_11 = arith.constant 5.000000e-01 : f32
    %40 = vector.broadcast %cst_11 : f32 to vector<32x64xf32>
    %41 = arith.mulf %40, %39 : vector<32x64xf32>
    %cst_12 = arith.constant 0.707106769 : f32
    %42 = vector.broadcast %cst_12 : f32 to vector<32x64xf32>
    %43 = arith.mulf %39, %42 : vector<32x64xf32>
    %44 = math.erf %43 : vector<32x64xf32>
    %cst_13 = arith.constant 1.000000e+00 : f32
    %45 = vector.broadcast %cst_13 : f32 to vector<32x64xf32>
    %46 = arith.addf %45, %44 : vector<32x64xf32>
    %47 = arith.mulf %41, %46 : vector<32x64xf32>
    %48 = arith.truncf %47 : vector<32x64xf32> to vector<32x64xbf16>
    %c0_14 = arith.constant 0 : index
    %c0_15 = arith.constant 0 : index
    %49 = vector.load %arg7[%c0_14, %c0_15] : memref<64x32xbf16, #tpu.memory_space<vmem>>, vector<64x32xbf16>
    %cst_16 = arith.constant dense<0.000000e+00> : vector<32x32xf32>
    %50 = tpu.matmul %48, %49, %cst_16 {dimension_numbers = #tpu.dot_dimension_numbers<[1], [0], [0], [1], [0, 0, 1, 1], [], []>} : vector<32x64xbf16>, vector<64x32xbf16>, vector<32x32xf32> -> vector<32x32xf32>
    %51 = vector.broadcast %20 : vector<1x32xf32> to vector<32x32xf32>
    %52 = arith.addf %50, %51 : vector<32x32xf32>
    %53 = arith.addf %52, %34 : vector<32x32xf32>
    %cst_17 = arith.constant dense<0.000000e+00> : vector<32xf32>
    %54 = vector.multi_reduction <add>, %53, %cst_17 [1] : vector<32x32xf32> to vector<32xf32>
    %55 = vector.shape_cast %54 : vector<32xf32> to vector<32x1xf32>
    %cst_18 = arith.constant 3.200000e+01 : f32
    %56 = vector.broadcast %cst_18 : f32 to vector<32x1xf32>
    %57 = arith.divf %55, %56 : vector<32x1xf32>
    %58 = vector.broadcast %57 : vector<32x1xf32> to vector<32x32xf32>
    %59 = arith.subf %53, %58 : vector<32x32xf32>
    %60 = arith.mulf %59, %59 : vector<32x32xf32>
    %cst_19 = arith.constant dense<0.000000e+00> : vector<32xf32>
    %61 = vector.multi_reduction <add>, %60, %cst_19 [1] : vector<32x32xf32> to vector<32xf32>
    %62 = vector.shape_cast %61 : vector<32xf32> to vector<32x1xf32>
    %cst_20 = arith.constant 3.200000e+01 : f32
    %63 = vector.broadcast %cst_20 : f32 to vector<32x1xf32>
    %64 = arith.divf %62, %63 : vector<32x1xf32>
    %cst_21 = arith.constant 9.99999974E-6 : f32
    %65 = vector.broadcast %cst_21 : f32 to vector<32x1xf32>
    %66 = arith.addf %64, %65 : vector<32x1xf32>
    %67 = math.rsqrt %66 : vector<32x1xf32>
    %68 = vector.broadcast %67 : vector<32x1xf32> to vector<32x32xf32>
    %69 = arith.mulf %59, %68 : vector<32x32xf32>
    %70 = vector.broadcast %22 : vector<1x32xf32> to vector<32x32xf32>
    %71 = arith.mulf %69, %70 : vector<32x32xf32>
    %72 = vector.broadcast %23 : vector<1x32xf32> to vector<32x32xf32>
    %73 = arith.addf %71, %72 : vector<32x32xf32>
    %74 = arith.truncf %73 : vector<32x32xf32> to vector<32x32xbf16>
    %c0_22 = arith.constant 0 : index
    %c0_23 = arith.constant 0 : index
    %75 = vector.load %arg8[%c0_22, %c0_23] : memref<32x32xbf16, #tpu.memory_space<vmem>>, vector<32x32xbf16>
    %cst_24 = arith.constant dense<0.000000e+00> : vector<32x32xf32>
    %76 = tpu.matmul %74, %75, %cst_24 {dimension_numbers = #tpu.dot_dimension_numbers<[1], [0], [0], [1], [0, 0, 1, 1], [], []>} : vector<32x32xbf16>, vector<32x32xbf16>, vector<32x32xf32> -> vector<32x32xf32>
    %77 = vector.broadcast %21 : vector<1x32xf32> to vector<32x32xf32>
    %78 = arith.addf %76, %77 : vector<32x32xf32>
    %79 = arith.negf %78 : vector<32x32xf32>
    %80 = math.exp %79 : vector<32x32xf32>
    %cst_25 = arith.constant 1.000000e+00 : f32
    %81 = vector.broadcast %cst_25 : f32 to vector<32x32xf32>
    %82 = arith.addf %81, %80 : vector<32x32xf32>
    %83 = arith.divf %81, %82 : vector<32x32xf32>
    %84 = arith.mulf %83, %73 : vector<32x32xf32>
    %c0_26 = arith.constant 0 : index
    %c0_27 = arith.constant 0 : index
    %85 = vector.load %arg3[%c0_26, %c0_27] : memref<16x8xbf16, #tpu.memory_space<vmem>>, vector<16x8xbf16>
    %c0_28 = arith.constant 0 : index
    %c0_29 = arith.constant 0 : index
    %86 = vector.load %arg4[%c0_28, %c0_29] : memref<8x16xbf16, #tpu.memory_space<vmem>>, vector<8x16xbf16>
    %c0_30 = arith.constant 0 : index
    %c0_31 = arith.constant 0 : index
    %87 = vector.load %arg5[%c0_30, %c0_31] : memref<8x8xbf16, #tpu.memory_space<vmem>>, vector<8x8xbf16>
    %c0_32 = arith.constant 0 : index
    %c0_33 = arith.constant 0 : index
    %88 = vector.load %arg1[%c0_32, %c0_33] : memref<32x32xf32, #tpu.memory_space<vmem>>, vector<8x32xf32>
    %89 = arith.truncf %88 : vector<8x32xf32> to vector<8x32xbf16>
    %cst_34 = arith.constant dense<0.000000e+00> : vector<16x32xf32>
    %90 = tpu.matmul %85, %89, %cst_34 {dimension_numbers = #tpu.dot_dimension_numbers<[1], [0], [0], [1], [0, 0, 1, 1], [], []>} : vector<16x8xbf16>, vector<8x32xbf16>, vector<16x32xf32> -> vector<16x32xf32>
    %91 = arith.addf %90, %32 : vector<16x32xf32>
    %cst_35 = arith.constant 5.000000e-01 : f32
    %92 = vector.broadcast %cst_35 : f32 to vector<16x32xf32>
    %93 = arith.mulf %92, %91 : vector<16x32xf32>
    %cst_36 = arith.constant 0.707106769 : f32
    %94 = vector.broadcast %cst_36 : f32 to vector<16x32xf32>
    %95 = arith.mulf %91, %94 : vector<16x32xf32>
    %96 = math.erf %95 : vector<16x32xf32>
    %cst_37 = arith.constant 1.000000e+00 : f32
    %97 = vector.broadcast %cst_37 : f32 to vector<16x32xf32>
    %98 = arith.addf %97, %96 : vector<16x32xf32>
    %99 = arith.mulf %93, %98 : vector<16x32xf32>
    %100 = arith.truncf %99 : vector<16x32xf32> to vector<16x32xbf16>
    %cst_38 = arith.constant dense<0.000000e+00> : vector<8x32xf32>
    %101 = tpu.matmul %86, %100, %cst_38 {dimension_numbers = #tpu.dot_dimension_numbers<[1], [0], [0], [1], [0, 0, 1, 1], [], []>} : vector<8x16xbf16>, vector<16x32xbf16>, vector<8x32xf32> -> vector<8x32xf32>
    %102 = arith.addf %101, %4 : vector<8x32xf32>
    %103 = arith.addf %102, %88 : vector<8x32xf32>
    %cst_39 = arith.constant dense<0.000000e+00> : vector<32xf32>
    %104 = vector.multi_reduction <add>, %103, %cst_39 [0] : vector<8x32xf32> to vector<32xf32>
    %105 = vector.shape_cast %104 : vector<32xf32> to vector<1x32xf32>
    %cst_40 = arith.constant 8.000000e+00 : f32
    %106 = vector.broadcast %cst_40 : f32 to vector<1x32xf32>
    %107 = arith.divf %105, %106 : vector<1x32xf32>
    %108 = vector.broadcast %107 : vector<1x32xf32> to vector<8x32xf32>
    %109 = arith.subf %103, %108 : vector<8x32xf32>
    %110 = arith.mulf %109, %109 : vector<8x32xf32>
    %cst_41 = arith.constant dense<0.000000e+00> : vector<32xf32>
    %111 = vector.multi_reduction <add>, %110, %cst_41 [0] : vector<8x32xf32> to vector<32xf32>
    %112 = vector.shape_cast %111 : vector<32xf32> to vector<1x32xf32>
    %cst_42 = arith.constant 8.000000e+00 : f32
    %113 = vector.broadcast %cst_42 : f32 to vector<1x32xf32>
    %114 = arith.divf %112, %113 : vector<1x32xf32>
    %cst_43 = arith.constant 9.99999974E-6 : f32
    %115 = vector.broadcast %cst_43 : f32 to vector<1x32xf32>
    %116 = arith.addf %114, %115 : vector<1x32xf32>
    %117 = math.rsqrt %116 : vector<1x32xf32>
    %118 = vector.broadcast %117 : vector<1x32xf32> to vector<8x32xf32>
    %119 = arith.mulf %109, %118 : vector<8x32xf32>
    %120 = arith.mulf %119, %10 : vector<8x32xf32>
    %121 = arith.addf %120, %13 : vector<8x32xf32>
    %122 = vector.extract_strided_slice %84 {offsets = [0, 0], sizes = [8, 32], strides = [1, 1]} : vector<32x32xf32> to vector<8x32xf32>
    %123 = arith.addf %121, %122 : vector<8x32xf32>
    %cst_44 = arith.constant dense<0.000000e+00> : vector<32xf32>
    %124 = vector.multi_reduction <add>, %123, %cst_44 [0] : vector<8x32xf32> to vector<32xf32>
    %125 = vector.shape_cast %124 : vector<32xf32> to vector<1x32xf32>
    %cst_45 = arith.constant 8.000000e+00 : f32
    %126 = vector.broadcast %cst_45 : f32 to vector<1x32xf32>
    %127 = arith.divf %125, %126 : vector<1x32xf32>
    %128 = vector.broadcast %127 : vector<1x32xf32> to vector<8x32xf32>
    %129 = arith.subf %123, %128 : vector<8x32xf32>
    %130 = arith.mulf %129, %129 : vector<8x32xf32>
    %cst_46 = arith.constant dense<0.000000e+00> : vector<32xf32>
    %131 = vector.multi_reduction <add>, %130, %cst_46 [0] : vector<8x32xf32> to vector<32xf32>
    %132 = vector.shape_cast %131 : vector<32xf32> to vector<1x32xf32>
    %cst_47 = arith.constant 8.000000e+00 : f32
    %133 = vector.broadcast %cst_47 : f32 to vector<1x32xf32>
    %134 = arith.divf %132, %133 : vector<1x32xf32>
    %cst_48 = arith.constant 9.99999974E-6 : f32
    %135 = vector.broadcast %cst_48 : f32 to vector<1x32xf32>
    %136 = arith.addf %134, %135 : vector<1x32xf32>
    %137 = math.rsqrt %136 : vector<1x32xf32>
    %138 = vector.broadcast %137 : vector<1x32xf32> to vector<8x32xf32>
    %139 = arith.mulf %129, %138 : vector<8x32xf32>
    %140 = arith.mulf %139, %16 : vector<8x32xf32>
    %141 = arith.addf %140, %19 : vector<8x32xf32>
    %142 = arith.truncf %141 : vector<8x32xf32> to vector<8x32xbf16>
    %cst_49 = arith.constant dense<0.000000e+00> : vector<8x32xf32>
    %143 = tpu.matmul %87, %142, %cst_49 {dimension_numbers = #tpu.dot_dimension_numbers<[1], [0], [0], [1], [0, 0, 1, 1], [], []>} : vector<8x8xbf16>, vector<8x32xbf16>, vector<8x32xf32> -> vector<8x32xf32>
    %144 = arith.addf %143, %7 : vector<8x32xf32>
    %145 = arith.negf %144 : vector<8x32xf32>
    %146 = math.exp %145 : vector<8x32xf32>
    %cst_50 = arith.constant 1.000000e+00 : f32
    %147 = vector.broadcast %cst_50 : f32 to vector<8x32xf32>
    %148 = arith.addf %147, %146 : vector<8x32xf32>
    %149 = arith.divf %147, %148 : vector<8x32xf32>
    %150 = arith.mulf %149, %141 : vector<8x32xf32>
    %c0_51 = arith.constant 0 : index
    %c0_52 = arith.constant 0 : index
    %151 = vector.load %arg13[%c0_51, %c0_52] : memref<32x32xf32, #tpu.memory_space<vmem>>, vector<8x32xf32>
    tpu.vector_store %arg13[%c0_51, %c0_52], %141 {strides = array<i32>} : memref<32x32xf32, #tpu.memory_space<vmem>>, vector<8x32xf32>,
    %152 = vector.extract_strided_slice %73 {offsets = [0, 0], sizes = [8, 32], strides = [1, 1]} : vector<32x32xf32> to vector<8x32xf32>
    %153 = arith.addf %152, %150 : vector<8x32xf32>
    %cst_53 = arith.constant dense<0.000000e+00> : vector<8xf32>
    %154 = vector.multi_reduction <add>, %153, %cst_53 [1] : vector<8x32xf32> to vector<8xf32>
    %155 = vector.shape_cast %154 : vector<8xf32> to vector<8x1xf32>
    %cst_54 = arith.constant 3.200000e+01 : f32
    %156 = vector.broadcast %cst_54 : f32 to vector<8x1xf32>
    %157 = arith.divf %155, %156 : vector<8x1xf32>
    %158 = vector.broadcast %157 : vector<8x1xf32> to vector<8x32xf32>
    %159 = arith.subf %153, %158 : vector<8x32xf32>
    %160 = arith.mulf %159, %159 : vector<8x32xf32>
    %cst_55 = arith.constant dense<0.000000e+00> : vector<8xf32>
    %161 = vector.multi_reduction <add>, %160, %cst_55 [1] : vector<8x32xf32> to vector<8xf32>
    %162 = vector.shape_cast %161 : vector<8xf32> to vector<8x1xf32>
    %cst_56 = arith.constant 3.200000e+01 : f32
    %163 = vector.broadcast %cst_56 : f32 to vector<8x1xf32>
    %164 = arith.divf %162, %163 : vector<8x1xf32>
    %cst_57 = arith.constant 9.99999974E-6 : f32
    %165 = vector.broadcast %cst_57 : f32 to vector<8x1xf32>
    %166 = arith.addf %164, %165 : vector<8x1xf32>
    %167 = math.rsqrt %166 : vector<8x1xf32>
    %168 = vector.broadcast %167 : vector<8x1xf32> to vector<8x32xf32>
    %169 = arith.mulf %159, %168 : vector<8x32xf32>
    %170 = arith.mulf %169, %26 : vector<8x32xf32>
    %171 = arith.addf %170, %29 : vector<8x32xf32>
    %c0_58 = arith.constant 0 : index
    %c0_59 = arith.constant 0 : index
    %172 = vector.load %arg14[%c0_58, %c0_59] : memref<32x32xf32, #tpu.memory_space<vmem>>, vector<8x32xf32>
    tpu.vector_store %arg14[%c0_58, %c0_59], %171 {strides = array<i32>} : memref<32x32xf32, #tpu.memory_space<vmem>>, vector<8x32xf32>,
    %c8 = arith.constant 8 : index
    %c0_60 = arith.constant 0 : index
    %173 = vector.load %arg1[%c8, %c0_60] : memref<32x32xf32, #tpu.memory_space<vmem>>, vector<8x32xf32>
    %174 = arith.truncf %173 : vector<8x32xf32> to vector<8x32xbf16>
    %cst_61 = arith.constant dense<0.000000e+00> : vector<16x32xf32>
    %175 = tpu.matmul %85, %174, %cst_61 {dimension_numbers = #tpu.dot_dimension_numbers<[1], [0], [0], [1], [0, 0, 1, 1], [], []>} : vector<16x8xbf16>, vector<8x32xbf16>, vector<16x32xf32> -> vector<16x32xf32>
    %176 = arith.addf %175, %32 : vector<16x32xf32>
    %cst_62 = arith.constant 5.000000e-01 : f32
    %177 = vector.broadcast %cst_62 : f32 to vector<16x32xf32>
    %178 = arith.mulf %177, %176 : vector<16x32xf32>
    %cst_63 = arith.constant 0.707106769 : f32
    %179 = vector.broadcast %cst_63 : f32 to vector<16x32xf32>
    %180 = arith.mulf %176, %179 : vector<16x32xf32>
    %181 = math.erf %180 : vector<16x32xf32>
    %cst_64 = arith.constant 1.000000e+00 : f32
    %182 = vector.broadcast %cst_64 : f32 to vector<16x32xf32>
    %183 = arith.addf %182, %181 : vector<16x32xf32>
    %184 = arith.mulf %178, %183 : vector<16x32xf32>
    %185 = arith.truncf %184 : vector<16x32xf32> to vector<16x32xbf16>
    %cst_65 = arith.constant dense<0.000000e+00> : vector<8x32xf32>
    %186 = tpu.matmul %86, %185, %cst_65 {dimension_numbers = #tpu.dot_dimension_numbers<[1], [0], [0], [1], [0, 0, 1, 1], [], []>} : vector<8x16xbf16>, vector<16x32xbf16>, vector<8x32xf32> -> vector<8x32xf32>
    %187 = arith.addf %186, %4 : vector<8x32xf32>
    %188 = arith.addf %187, %173 : vector<8x32xf32>
    %cst_66 = arith.constant dense<0.000000e+00> : vector<32xf32>
    %189 = vector.multi_reduction <add>, %188, %cst_66 [0] : vector<8x32xf32> to vector<32xf32>
    %190 = vector.shape_cast %189 : vector<32xf32> to vector<1x32xf32>
    %cst_67 = arith.constant 8.000000e+00 : f32
    %191 = vector.broadcast %cst_67 : f32 to vector<1x32xf32>
    %192 = arith.divf %190, %191 : vector<1x32xf32>
    %193 = vector.broadcast %192 : vector<1x32xf32> to vector<8x32xf32>
    %194 = arith.subf %188, %193 : vector<8x32xf32>
    %195 = arith.mulf %194, %194 : vector<8x32xf32>
    %cst_68 = arith.constant dense<0.000000e+00> : vector<32xf32>
    %196 = vector.multi_reduction <add>, %195, %cst_68 [0] : vector<8x32xf32> to vector<32xf32>
    %197 = vector.shape_cast %196 : vector<32xf32> to vector<1x32xf32>
    %cst_69 = arith.constant 8.000000e+00 : f32
    %198 = vector.broadcast %cst_69 : f32 to vector<1x32xf32>
    %199 = arith.divf %197, %198 : vector<1x32xf32>
    %cst_70 = arith.constant 9.99999974E-6 : f32
    %200 = vector.broadcast %cst_70 : f32 to vector<1x32xf32>
    %201 = arith.addf %199, %200 : vector<1x32xf32>
    %202 = math.rsqrt %201 : vector<1x32xf32>
    %203 = vector.broadcast %202 : vector<1x32xf32> to vector<8x32xf32>
    %204 = arith.mulf %194, %203 : vector<8x32xf32>
    %205 = arith.mulf %204, %10 : vector<8x32xf32>
    %206 = arith.addf %205, %13 : vector<8x32xf32>
    %207 = vector.extract_strided_slice %84 {offsets = [8, 0], sizes = [8, 32], strides = [1, 1]} : vector<32x32xf32> to vector<8x32xf32>
    %208 = arith.addf %206, %207 : vector<8x32xf32>
    %cst_71 = arith.constant dense<0.000000e+00> : vector<32xf32>
    %209 = vector.multi_reduction <add>, %208, %cst_71 [0] : vector<8x32xf32> to vector<32xf32>
    %210 = vector.shape_cast %209 : vector<32xf32> to vector<1x32xf32>
    %cst_72 = arith.constant 8.000000e+00 : f32
    %211 = vector.broadcast %cst_72 : f32 to vector<1x32xf32>
    %212 = arith.divf %210, %211 : vector<1x32xf32>
    %213 = vector.broadcast %212 : vector<1x32xf32> to vector<8x32xf32>
    %214 = arith.subf %208, %213 : vector<8x32xf32>
    %215 = arith.mulf %214, %214 : vector<8x32xf32>
    %cst_73 = arith.constant dense<0.000000e+00> : vector<32xf32>
    %216 = vector.multi_reduction <add>, %215, %cst_73 [0] : vector<8x32xf32> to vector<32xf32>
    %217 = vector.shape_cast %216 : vector<32xf32> to vector<1x32xf32>
    %cst_74 = arith.constant 8.000000e+00 : f32
    %218 = vector.broadcast %cst_74 : f32 to vector<1x32xf32>
    %219 = arith.divf %217, %218 : vector<1x32xf32>
    %cst_75 = arith.constant 9.99999974E-6 : f32
    %220 = vector.broadcast %cst_75 : f32 to vector<1x32xf32>
    %221 = arith.addf %219, %220 : vector<1x32xf32>
    %222 = math.rsqrt %221 : vector<1x32xf32>
    %223 = vector.broadcast %222 : vector<1x32xf32> to vector<8x32xf32>
    %224 = arith.mulf %214, %223 : vector<8x32xf32>
    %225 = arith.mulf %224, %16 : vector<8x32xf32>
    %226 = arith.addf %225, %19 : vector<8x32xf32>
    %227 = arith.truncf %226 : vector<8x32xf32> to vector<8x32xbf16>
    %cst_76 = arith.constant dense<0.000000e+00> : vector<8x32xf32>
    %228 = tpu.matmul %87, %227, %cst_76 {dimension_numbers = #tpu.dot_dimension_numbers<[1], [0], [0], [1], [0, 0, 1, 1], [], []>} : vector<8x8xbf16>, vector<8x32xbf16>, vector<8x32xf32> -> vector<8x32xf32>
    %229 = arith.addf %228, %7 : vector<8x32xf32>
    %230 = arith.negf %229 : vector<8x32xf32>
    %231 = math.exp %230 : vector<8x32xf32>
    %cst_77 = arith.constant 1.000000e+00 : f32
    %232 = vector.broadcast %cst_77 : f32 to vector<8x32xf32>
    %233 = arith.addf %232, %231 : vector<8x32xf32>
    %234 = arith.divf %232, %233 : vector<8x32xf32>
    %235 = arith.mulf %234, %226 : vector<8x32xf32>
    %c8_78 = arith.constant 8 : index
    %c0_79 = arith.constant 0 : index
    %236 = vector.load %arg13[%c8_78, %c0_79] : memref<32x32xf32, #tpu.memory_space<vmem>>, vector<8x32xf32>
    tpu.vector_store %arg13[%c8_78, %c0_79], %226 {strides = array<i32>} : memref<32x32xf32, #tpu.memory_space<vmem>>, vector<8x32xf32>,
    %237 = vector.extract_strided_slice %73 {offsets = [8, 0], sizes = [8, 32], strides = [1, 1]} : vector<32x32xf32> to vector<8x32xf32>
    %238 = arith.addf %237, %235 : vector<8x32xf32>
    %cst_80 = arith.constant dense<0.000000e+00> : vector<8xf32>
    %239 = vector.multi_reduction <add>, %238, %cst_80 [1] : vector<8x32xf32> to vector<8xf32>
    %240 = vector.shape_cast %239 : vector<8xf32> to vector<8x1xf32>
    %cst_81 = arith.constant 3.200000e+01 : f32
    %241 = vector.broadcast %cst_81 : f32 to vector<8x1xf32>
    %242 = arith.divf %240, %241 : vector<8x1xf32>
    %243 = vector.broadcast %242 : vector<8x1xf32> to vector<8x32xf32>
    %244 = arith.subf %238, %243 : vector<8x32xf32>
    %245 = arith.mulf %244, %244 : vector<8x32xf32>
    %cst_82 = arith.constant dense<0.000000e+00> : vector<8xf32>
    %246 = vector.multi_reduction <add>, %245, %cst_82 [1] : vector<8x32xf32> to vector<8xf32>
    %247 = vector.shape_cast %246 : vector<8xf32> to vector<8x1xf32>
    %cst_83 = arith.constant 3.200000e+01 : f32
    %248 = vector.broadcast %cst_83 : f32 to vector<8x1xf32>
    %249 = arith.divf %247, %248 : vector<8x1xf32>
    %cst_84 = arith.constant 9.99999974E-6 : f32
    %250 = vector.broadcast %cst_84 : f32 to vector<8x1xf32>
    %251 = arith.addf %249, %250 : vector<8x1xf32>
    %252 = math.rsqrt %251 : vector<8x1xf32>
    %253 = vector.broadcast %252 : vector<8x1xf32> to vector<8x32xf32>
    %254 = arith.mulf %244, %253 : vector<8x32xf32>
    %255 = arith.mulf %254, %26 : vector<8x32xf32>
    %256 = arith.addf %255, %29 : vector<8x32xf32>
    %c8_85 = arith.constant 8 : index
    %c0_86 = arith.constant 0 : index
    %257 = vector.load %arg14[%c8_85, %c0_86] : memref<32x32xf32, #tpu.memory_space<vmem>>, vector<8x32xf32>
    tpu.vector_store %arg14[%c8_85, %c0_86], %256 {strides = array<i32>} : memref<32x32xf32, #tpu.memory_space<vmem>>, vector<8x32xf32>,
    %c16 = arith.constant 16 : index
    %c0_87 = arith.constant 0 : index
    %258 = vector.load %arg1[%c16, %c0_87] : memref<32x32xf32, #tpu.memory_space<vmem>>, vector<8x32xf32>
    %259 = arith.truncf %258 : vector<8x32xf32> to vector<8x32xbf16>
    %cst_88 = arith.constant dense<0.000000e+00> : vector<16x32xf32>
    %260 = tpu.matmul %85, %259, %cst_88 {dimension_numbers = #tpu.dot_dimension_numbers<[1], [0], [0], [1], [0, 0, 1, 1], [], []>} : vector<16x8xbf16>, vector<8x32xbf16>, vector<16x32xf32> -> vector<16x32xf32>
    %261 = arith.addf %260, %32 : vector<16x32xf32>
    %cst_89 = arith.constant 5.000000e-01 : f32
    %262 = vector.broadcast %cst_89 : f32 to vector<16x32xf32>
    %263 = arith.mulf %262, %261 : vector<16x32xf32>
    %cst_90 = arith.constant 0.707106769 : f32
    %264 = vector.broadcast %cst_90 : f32 to vector<16x32xf32>
    %265 = arith.mulf %261, %264 : vector<16x32xf32>
    %266 = math.erf %265 : vector<16x32xf32>
    %cst_91 = arith.constant 1.000000e+00 : f32
    %267 = vector.broadcast %cst_91 : f32 to vector<16x32xf32>
    %268 = arith.addf %267, %266 : vector<16x32xf32>
    %269 = arith.mulf %263, %268 : vector<16x32xf32>
    %270 = arith.truncf %269 : vector<16x32xf32> to vector<16x32xbf16>
    %cst_92 = arith.constant dense<0.000000e+00> : vector<8x32xf32>
    %271 = tpu.matmul %86, %270, %cst_92 {dimension_numbers = #tpu.dot_dimension_numbers<[1], [0], [0], [1], [0, 0, 1, 1], [], []>} : vector<8x16xbf16>, vector<16x32xbf16>, vector<8x32xf32> -> vector<8x32xf32>
    %272 = arith.addf %271, %4 : vector<8x32xf32>
    %273 = arith.addf %272, %258 : vector<8x32xf32>
    %cst_93 = arith.constant dense<0.000000e+00> : vector<32xf32>
    %274 = vector.multi_reduction <add>, %273, %cst_93 [0] : vector<8x32xf32> to vector<32xf32>
    %275 = vector.shape_cast %274 : vector<32xf32> to vector<1x32xf32>
    %cst_94 = arith.constant 8.000000e+00 : f32
    %276 = vector.broadcast %cst_94 : f32 to vector<1x32xf32>
    %277 = arith.divf %275, %276 : vector<1x32xf32>
    %278 = vector.broadcast %277 : vector<1x32xf32> to vector<8x32xf32>
    %279 = arith.subf %273, %278 : vector<8x32xf32>
    %280 = arith.mulf %279, %279 : vector<8x32xf32>
    %cst_95 = arith.constant dense<0.000000e+00> : vector<32xf32>
    %281 = vector.multi_reduction <add>, %280, %cst_95 [0] : vector<8x32xf32> to vector<32xf32>
    %282 = vector.shape_cast %281 : vector<32xf32> to vector<1x32xf32>
    %cst_96 = arith.constant 8.000000e+00 : f32
    %283 = vector.broadcast %cst_96 : f32 to vector<1x32xf32>
    %284 = arith.divf %282, %283 : vector<1x32xf32>
    %cst_97 = arith.constant 9.99999974E-6 : f32
    %285 = vector.broadcast %cst_97 : f32 to vector<1x32xf32>
    %286 = arith.addf %284, %285 : vector<1x32xf32>
    %287 = math.rsqrt %286 : vector<1x32xf32>
    %288 = vector.broadcast %287 : vector<1x32xf32> to vector<8x32xf32>
    %289 = arith.mulf %279, %288 : vector<8x32xf32>
    %290 = arith.mulf %289, %10 : vector<8x32xf32>
    %291 = arith.addf %290, %13 : vector<8x32xf32>
    %292 = vector.extract_strided_slice %84 {offsets = [16, 0], sizes = [8, 32], strides = [1, 1]} : vector<32x32xf32> to vector<8x32xf32>
    %293 = arith.addf %291, %292 : vector<8x32xf32>
    %cst_98 = arith.constant dense<0.000000e+00> : vector<32xf32>
    %294 = vector.multi_reduction <add>, %293, %cst_98 [0] : vector<8x32xf32> to vector<32xf32>
    %295 = vector.shape_cast %294 : vector<32xf32> to vector<1x32xf32>
    %cst_99 = arith.constant 8.000000e+00 : f32
    %296 = vector.broadcast %cst_99 : f32 to vector<1x32xf32>
    %297 = arith.divf %295, %296 : vector<1x32xf32>
    %298 = vector.broadcast %297 : vector<1x32xf32> to vector<8x32xf32>
    %299 = arith.subf %293, %298 : vector<8x32xf32>
    %300 = arith.mulf %299, %299 : vector<8x32xf32>
    %cst_100 = arith.constant dense<0.000000e+00> : vector<32xf32>
    %301 = vector.multi_reduction <add>, %300, %cst_100 [0] : vector<8x32xf32> to vector<32xf32>
    %302 = vector.shape_cast %301 : vector<32xf32> to vector<1x32xf32>
    %cst_101 = arith.constant 8.000000e+00 : f32
    %303 = vector.broadcast %cst_101 : f32 to vector<1x32xf32>
    %304 = arith.divf %302, %303 : vector<1x32xf32>
    %cst_102 = arith.constant 9.99999974E-6 : f32
    %305 = vector.broadcast %cst_102 : f32 to vector<1x32xf32>
    %306 = arith.addf %304, %305 : vector<1x32xf32>
    %307 = math.rsqrt %306 : vector<1x32xf32>
    %308 = vector.broadcast %307 : vector<1x32xf32> to vector<8x32xf32>
    %309 = arith.mulf %299, %308 : vector<8x32xf32>
    %310 = arith.mulf %309, %16 : vector<8x32xf32>
    %311 = arith.addf %310, %19 : vector<8x32xf32>
    %312 = arith.truncf %311 : vector<8x32xf32> to vector<8x32xbf16>
    %cst_103 = arith.constant dense<0.000000e+00> : vector<8x32xf32>
    %313 = tpu.matmul %87, %312, %cst_103 {dimension_numbers = #tpu.dot_dimension_numbers<[1], [0], [0], [1], [0, 0, 1, 1], [], []>} : vector<8x8xbf16>, vector<8x32xbf16>, vector<8x32xf32> -> vector<8x32xf32>
    %314 = arith.addf %313, %7 : vector<8x32xf32>
    %315 = arith.negf %314 : vector<8x32xf32>
    %316 = math.exp %315 : vector<8x32xf32>
    %cst_104 = arith.constant 1.000000e+00 : f32
    %317 = vector.broadcast %cst_104 : f32 to vector<8x32xf32>
    %318 = arith.addf %317, %316 : vector<8x32xf32>
    %319 = arith.divf %317, %318 : vector<8x32xf32>
    %320 = arith.mulf %319, %311 : vector<8x32xf32>
    %c16_105 = arith.constant 16 : index
    %c0_106 = arith.constant 0 : index
    %321 = vector.load %arg13[%c16_105, %c0_106] : memref<32x32xf32, #tpu.memory_space<vmem>>, vector<8x32xf32>
    tpu.vector_store %arg13[%c16_105, %c0_106], %311 {strides = array<i32>} : memref<32x32xf32, #tpu.memory_space<vmem>>, vector<8x32xf32>,
    %322 = vector.extract_strided_slice %73 {offsets = [16, 0], sizes = [8, 32], strides = [1, 1]} : vector<32x32xf32> to vector<8x32xf32>
    %323 = arith.addf %322, %320 : vector<8x32xf32>
    %cst_107 = arith.constant dense<0.000000e+00> : vector<8xf32>
    %324 = vector.multi_reduction <add>, %323, %cst_107 [1] : vector<8x32xf32> to vector<8xf32>
    %325 = vector.shape_cast %324 : vector<8xf32> to vector<8x1xf32>
    %cst_108 = arith.constant 3.200000e+01 : f32
    %326 = vector.broadcast %cst_108 : f32 to vector<8x1xf32>
    %327 = arith.divf %325, %326 : vector<8x1xf32>
    %328 = vector.broadcast %327 : vector<8x1xf32> to vector<8x32xf32>
    %329 = arith.subf %323, %328 : vector<8x32xf32>
    %330 = arith.mulf %329, %329 : vector<8x32xf32>
    %cst_109 = arith.constant dense<0.000000e+00> : vector<8xf32>
    %331 = vector.multi_reduction <add>, %330, %cst_109 [1] : vector<8x32xf32> to vector<8xf32>
    %332 = vector.shape_cast %331 : vector<8xf32> to vector<8x1xf32>
    %cst_110 = arith.constant 3.200000e+01 : f32
    %333 = vector.broadcast %cst_110 : f32 to vector<8x1xf32>
    %334 = arith.divf %332, %333 : vector<8x1xf32>
    %cst_111 = arith.constant 9.99999974E-6 : f32
    %335 = vector.broadcast %cst_111 : f32 to vector<8x1xf32>
    %336 = arith.addf %334, %335 : vector<8x1xf32>
    %337 = math.rsqrt %336 : vector<8x1xf32>
    %338 = vector.broadcast %337 : vector<8x1xf32> to vector<8x32xf32>
    %339 = arith.mulf %329, %338 : vector<8x32xf32>
    %340 = arith.mulf %339, %26 : vector<8x32xf32>
    %341 = arith.addf %340, %29 : vector<8x32xf32>
    %c16_112 = arith.constant 16 : index
    %c0_113 = arith.constant 0 : index
    %342 = vector.load %arg14[%c16_112, %c0_113] : memref<32x32xf32, #tpu.memory_space<vmem>>, vector<8x32xf32>
    tpu.vector_store %arg14[%c16_112, %c0_113], %341 {strides = array<i32>} : memref<32x32xf32, #tpu.memory_space<vmem>>, vector<8x32xf32>,
    %c24 = arith.constant 24 : index
    %c0_114 = arith.constant 0 : index
    %343 = vector.load %arg1[%c24, %c0_114] : memref<32x32xf32, #tpu.memory_space<vmem>>, vector<8x32xf32>
    %344 = arith.truncf %343 : vector<8x32xf32> to vector<8x32xbf16>
    %cst_115 = arith.constant dense<0.000000e+00> : vector<16x32xf32>
    %345 = tpu.matmul %85, %344, %cst_115 {dimension_numbers = #tpu.dot_dimension_numbers<[1], [0], [0], [1], [0, 0, 1, 1], [], []>} : vector<16x8xbf16>, vector<8x32xbf16>, vector<16x32xf32> -> vector<16x32xf32>
    %346 = arith.addf %345, %32 : vector<16x32xf32>
    %cst_116 = arith.constant 5.000000e-01 : f32
    %347 = vector.broadcast %cst_116 : f32 to vector<16x32xf32>
    %348 = arith.mulf %347, %346 : vector<16x32xf32>
    %cst_117 = arith.constant 0.707106769 : f32
    %349 = vector.broadcast %cst_117 : f32 to vector<16x32xf32>
    %350 = arith.mulf %346, %349 : vector<16x32xf32>
    %351 = math.erf %350 : vector<16x32xf32>
    %cst_118 = arith.constant 1.000000e+00 : f32
    %352 = vector.broadcast %cst_118 : f32 to vector<16x32xf32>
    %353 = arith.addf %352, %351 : vector<16x32xf32>
    %354 = arith.mulf %348, %353 : vector<16x32xf32>
    %355 = arith.truncf %354 : vector<16x32xf32> to vector<16x32xbf16>
    %cst_119 = arith.constant dense<0.000000e+00> : vector<8x32xf32>
    %356 = tpu.matmul %86, %355, %cst_119 {dimension_numbers = #tpu.dot_dimension_numbers<[1], [0], [0], [1], [0, 0, 1, 1], [], []>} : vector<8x16xbf16>, vector<16x32xbf16>, vector<8x32xf32> -> vector<8x32xf32>
    %357 = arith.addf %356, %4 : vector<8x32xf32>
    %358 = arith.addf %357, %343 : vector<8x32xf32>
    %cst_120 = arith.constant dense<0.000000e+00> : vector<32xf32>
    %359 = vector.multi_reduction <add>, %358, %cst_120 [0] : vector<8x32xf32> to vector<32xf32>
    %360 = vector.shape_cast %359 : vector<32xf32> to vector<1x32xf32>
    %cst_121 = arith.constant 8.000000e+00 : f32
    %361 = vector.broadcast %cst_121 : f32 to vector<1x32xf32>
    %362 = arith.divf %360, %361 : vector<1x32xf32>
    %363 = vector.broadcast %362 : vector<1x32xf32> to vector<8x32xf32>
    %364 = arith.subf %358, %363 : vector<8x32xf32>
    %365 = arith.mulf %364, %364 : vector<8x32xf32>
    %cst_122 = arith.constant dense<0.000000e+00> : vector<32xf32>
    %366 = vector.multi_reduction <add>, %365, %cst_122 [0] : vector<8x32xf32> to vector<32xf32>
    %367 = vector.shape_cast %366 : vector<32xf32> to vector<1x32xf32>
    %cst_123 = arith.constant 8.000000e+00 : f32
    %368 = vector.broadcast %cst_123 : f32 to vector<1x32xf32>
    %369 = arith.divf %367, %368 : vector<1x32xf32>
    %cst_124 = arith.constant 9.99999974E-6 : f32
    %370 = vector.broadcast %cst_124 : f32 to vector<1x32xf32>
    %371 = arith.addf %369, %370 : vector<1x32xf32>
    %372 = math.rsqrt %371 : vector<1x32xf32>
    %373 = vector.broadcast %372 : vector<1x32xf32> to vector<8x32xf32>
    %374 = arith.mulf %364, %373 : vector<8x32xf32>
    %375 = arith.mulf %374, %10 : vector<8x32xf32>
    %376 = arith.addf %375, %13 : vector<8x32xf32>
    %377 = vector.extract_strided_slice %84 {offsets = [24, 0], sizes = [8, 32], strides = [1, 1]} : vector<32x32xf32> to vector<8x32xf32>
    %378 = arith.addf %376, %377 : vector<8x32xf32>
    %cst_125 = arith.constant dense<0.000000e+00> : vector<32xf32>
    %379 = vector.multi_reduction <add>, %378, %cst_125 [0] : vector<8x32xf32> to vector<32xf32>
    %380 = vector.shape_cast %379 : vector<32xf32> to vector<1x32xf32>
    %cst_126 = arith.constant 8.000000e+00 : f32
    %381 = vector.broadcast %cst_126 : f32 to vector<1x32xf32>
    %382 = arith.divf %380, %381 : vector<1x32xf32>
    %383 = vector.broadcast %382 : vector<1x32xf32> to vector<8x32xf32>
    %384 = arith.subf %378, %383 : vector<8x32xf32>
    %385 = arith.mulf %384, %384 : vector<8x32xf32>
    %cst_127 = arith.constant dense<0.000000e+00> : vector<32xf32>
    %386 = vector.multi_reduction <add>, %385, %cst_127 [0] : vector<8x32xf32> to vector<32xf32>
    %387 = vector.shape_cast %386 : vector<32xf32> to vector<1x32xf32>
    %cst_128 = arith.constant 8.000000e+00 : f32
    %388 = vector.broadcast %cst_128 : f32 to vector<1x32xf32>
    %389 = arith.divf %387, %388 : vector<1x32xf32>
    %cst_129 = arith.constant 9.99999974E-6 : f32
    %390 = vector.broadcast %cst_129 : f32 to vector<1x32xf32>
    %391 = arith.addf %389, %390 : vector<1x32xf32>
    %392 = math.rsqrt %391 : vector<1x32xf32>
    %393 = vector.broadcast %392 : vector<1x32xf32> to vector<8x32xf32>
    %394 = arith.mulf %384, %393 : vector<8x32xf32>
    %395 = arith.mulf %394, %16 : vector<8x32xf32>
    %396 = arith.addf %395, %19 : vector<8x32xf32>
    %397 = arith.truncf %396 : vector<8x32xf32> to vector<8x32xbf16>
    %cst_130 = arith.constant dense<0.000000e+00> : vector<8x32xf32>
    %398 = tpu.matmul %87, %397, %cst_130 {dimension_numbers = #tpu.dot_dimension_numbers<[1], [0], [0], [1], [0, 0, 1, 1], [], []>} : vector<8x8xbf16>, vector<8x32xbf16>, vector<8x32xf32> -> vector<8x32xf32>
    %399 = arith.addf %398, %7 : vector<8x32xf32>
    %400 = arith.negf %399 : vector<8x32xf32>
    %401 = math.exp %400 : vector<8x32xf32>
    %cst_131 = arith.constant 1.000000e+00 : f32
    %402 = vector.broadcast %cst_131 : f32 to vector<8x32xf32>
    %403 = arith.addf %402, %401 : vector<8x32xf32>
    %404 = arith.divf %402, %403 : vector<8x32xf32>
    %405 = arith.mulf %404, %396 : vector<8x32xf32>
    %c24_132 = arith.constant 24 : index
    %c0_133 = arith.constant 0 : index
    %406 = vector.load %arg13[%c24_132, %c0_133] : memref<32x32xf32, #tpu.memory_space<vmem>>, vector<8x32xf32>
    tpu.vector_store %arg13[%c24_132, %c0_133], %396 {strides = array<i32>} : memref<32x32xf32, #tpu.memory_space<vmem>>, vector<8x32xf32>,
    %407 = vector.extract_strided_slice %73 {offsets = [24, 0], sizes = [8, 32], strides = [1, 1]} : vector<32x32xf32> to vector<8x32xf32>
    %408 = arith.addf %407, %405 : vector<8x32xf32>
    %cst_134 = arith.constant dense<0.000000e+00> : vector<8xf32>
    %409 = vector.multi_reduction <add>, %408, %cst_134 [1] : vector<8x32xf32> to vector<8xf32>
    %410 = vector.shape_cast %409 : vector<8xf32> to vector<8x1xf32>
    %cst_135 = arith.constant 3.200000e+01 : f32
    %411 = vector.broadcast %cst_135 : f32 to vector<8x1xf32>
    %412 = arith.divf %410, %411 : vector<8x1xf32>
    %413 = vector.broadcast %412 : vector<8x1xf32> to vector<8x32xf32>
    %414 = arith.subf %408, %413 : vector<8x32xf32>
    %415 = arith.mulf %414, %414 : vector<8x32xf32>
    %cst_136 = arith.constant dense<0.000000e+00> : vector<8xf32>
    %416 = vector.multi_reduction <add>, %415, %cst_136 [1] : vector<8x32xf32> to vector<8xf32>
    %417 = vector.shape_cast %416 : vector<8xf32> to vector<8x1xf32>
    %cst_137 = arith.constant 3.200000e+01 : f32
    %418 = vector.broadcast %cst_137 : f32 to vector<8x1xf32>
    %419 = arith.divf %417, %418 : vector<8x1xf32>
    %cst_138 = arith.constant 9.99999974E-6 : f32
    %420 = vector.broadcast %cst_138 : f32 to vector<8x1xf32>
    %421 = arith.addf %419, %420 : vector<8x1xf32>
    %422 = math.rsqrt %421 : vector<8x1xf32>
    %423 = vector.broadcast %422 : vector<8x1xf32> to vector<8x32xf32>
    %424 = arith.mulf %414, %423 : vector<8x32xf32>
    %425 = arith.mulf %424, %26 : vector<8x32xf32>
    %426 = arith.addf %425, %29 : vector<8x32xf32>
    %c24_139 = arith.constant 24 : index
    %c0_140 = arith.constant 0 : index
    %427 = vector.load %arg14[%c24_139, %c0_140] : memref<32x32xf32, #tpu.memory_space<vmem>>, vector<8x32xf32>
    tpu.vector_store %arg14[%c24_139, %c0_140], %426 {strides = array<i32>} : memref<32x32xf32, #tpu.memory_space<vmem>>, vector<8x32xf32>,
    return
  }
  func.func @transform_0(%arg0: i32) -> (i32, i32) {
    %c0_i32 = arith.constant 0 : i32
    %c0_i32_0 = arith.constant 0 : i32
    return %arg0, %c0_i32 : i32, i32
  }
  func.func @transform_1(%arg0: i32) -> (i32, i32) {
    %c0_i32 = arith.constant 0 : i32
    %c0_i32_0 = arith.constant 0 : i32
    return %arg0, %c0_i32 : i32, i32
  }
  func.func @transform_2(%arg0: i32) -> (i32, i32) {
    %c0_i32 = arith.constant 0 : i32
    %c0_i32_0 = arith.constant 0 : i32
    %c0_i32_1 = arith.constant 0 : i32
    return %c0_i32, %c0_i32_0 : i32, i32
  }
  func.func @transform_3(%arg0: i32) -> (i32, i32) {
    %c0_i32 = arith.constant 0 : i32
    %c0_i32_0 = arith.constant 0 : i32
    %c0_i32_1 = arith.constant 0 : i32
    return %c0_i32, %c0_i32_0 : i32, i32
  }
  func.func @transform_4(%arg0: i32) -> (i32, i32) {
    %c0_i32 = arith.constant 0 : i32
    %c0_i32_0 = arith.constant 0 : i32
    %c0_i32_1 = arith.constant 0 : i32
    return %c0_i32, %c0_i32_0 : i32, i32
  }
  func.func @transform_5(%arg0: i32) -> (i32, i32) {
    %c0_i32 = arith.constant 0 : i32
    %c0_i32_0 = arith.constant 0 : i32
    %c0_i32_1 = arith.constant 0 : i32
    return %c0_i32, %c0_i32_0 : i32, i32
  }
  func.func @transform_6(%arg0: i32) -> (i32, i32) {
    %c0_i32 = arith.constant 0 : i32
    %c0_i32_0 = arith.constant 0 : i32
    %c0_i32_1 = arith.constant 0 : i32
    return %c0_i32, %c0_i32_0 : i32, i32
  }
  func.func @transform_7(%arg0: i32) -> (i32, i32) {
    %c0_i32 = arith.constant 0 : i32
    %c0_i32_0 = arith.constant 0 : i32
    %c0_i32_1 = arith.constant 0 : i32
    return %c0_i32, %c0_i32_0 : i32, i32
  }
  func.func @transform_8(%arg0: i32) -> (i32, i32) {
    %c0_i32 = arith.constant 0 : i32
    %c0_i32_0 = arith.constant 0 : i32
    %c0_i32_1 = arith.constant 0 : i32
    return %c0_i32, %c0_i32_0 : i32, i32
  }
  func.func @transform_9(%arg0: i32) -> (i32, i32) {
    %c0_i32 = arith.constant 0 : i32
    %c0_i32_0 = arith.constant 0 : i32
    %c0_i32_1 = arith.constant 0 : i32
    return %c0_i32, %c0_i32_0 : i32, i32
  }
  func.func @transform_10(%arg0: i32) -> (i32, i32) {
    %c0_i32 = arith.constant 0 : i32
    %c0_i32_0 = arith.constant 0 : i32
    %c0_i32_1 = arith.constant 0 : i32
    return %c0_i32, %c0_i32_0 : i32, i32
  }
  func.func @transform_11(%arg0: i32) -> (i32, i32) {
    %c0_i32 = arith.constant 0 : i32
    %c0_i32_0 = arith.constant 0 : i32
    %c0_i32_1 = arith.constant 0 : i32
    return %c0_i32, %c0_i32_0 : i32, i32
  }
  func.func @transform_12(%arg0: i32) -> (i32, i32) {
    %c0_i32 = arith.constant 0 : i32
    %c0_i32_0 = arith.constant 0 : i32
    return %arg0, %c0_i32 : i32, i32
  }
  func.func @transform_13(%arg0: i32) -> (i32, i32) {
    %c0_i32 = arith.constant 0 : i32
    %c0_i32_0 = arith.constant 0 : i32
    return %arg0, %c0_i32 : i32, i32
  }
}

</mosaic_0001>

<bundles_post_ra>
// kernel: tpu_custom_call.1
= control target key start
LH: loop header
LB: loop body
LE: loop exit
PB: predicated region body
PF: predicated region fallthrough
CT: control target
= control target key end

     0   :  { %s2281_s25 = smov 0   ;;  %s2664_s0 = inlined_call_operand.vmem [shape: f32[64,32], index: 0, kind: input, shape index: {}]   ;;  %s2665_s1 = inlined_call_operand.vmem [shape: f32[64,32], index: 1, kind: input, shape index: {}]   ;;  %s2666_s2 = inlined_call_operand.vmem [shape: bf16[16,8], index: 2, kind: input, shape index: {}]   ;;  %s2667_s3 = inlined_call_operand.vmem [shape: bf16[8,16], index: 3, kind: input, shape index: {}]   ;;  %s2668_s4 = inlined_call_operand.vmem [shape: bf16[8,8], index: 4, kind: input, shape index: {}]   ;;  %s2669_s5 = inlined_call_operand.vmem [shape: bf16[32,64], index: 5, kind: input, shape index: {}]   ;;  %s2670_s6 = inlined_call_operand.vmem [shape: bf16[64,32], index: 6, kind: input, shape index: {}]   ;;  %s2671_s7 = inlined_call_operand.vmem [shape: bf16[32,32], index: 7, kind: input, shape index: {}]   ;;  %s2672_s8 = inlined_call_operand.vmem [shape: f32[16,1], index: 8, kind: input, shape index: {}]   ;;  %s2673_s9 = inlined_call_operand.vmem [shape: f32[1,64], index: 9, kind: input, shape index: {}]   ;;  %s2674_s10 = inlined_call_operand.vmem [shape: f32[8,6], index: 10, kind: input, shape index: {}]   ;;  %s2675_s11 = inlined_call_operand.vmem [shape: f32[6,32], index: 11, kind: input, shape index: {}]   ;;  %s2676_s12 = inlined_call_operand.vmem [shape: f32[64,32], index: 12, kind: output, shape index: {0}]   ;;  %s2677_s13 = inlined_call_operand.vmem [shape: f32[64,32], index: 13, kind: output, shape index: {1}]  }
   0x1 LB: > { %s1885_s26 = sadd.s32 4294967295, %s2201_s25   ;;  %p1889_p0 = scmp.ge.s32.totalorder %s2201_s25, 1  ;;  %s2201_s25 = sphi %s2281_s25, %s24_s25  }
   0x2   : > { %p402_p1 = scmp.lt.s32.totalorder %s2201_s25, 3 }
   0x4   : > { %p403_p2 = pnand %p1889_p0, %p402_p1 }
   0x5   : > { %v2097_v0 = vld [vmem:[%s2669_s5] sm:$0xff] (!%p403_p2)   ;;  %s1890_s29 = sshll.u32 (!%p403_p2), %s1885_s26, 2  ;;  %v2098_v1 = vld [vmem:[%s2669_s5 + $0x8] sm:$0xff] (!%p403_p2)   ;;  %vm557_vm0 = vcmask (!%p403_p2), 261120   ;;  %v2101_v10 = vld [vmem:[%s2670_s6 + $0x10] sm:$0xff] (!%p403_p2)   ;;  %vm671_vm1 = vcmask (!%p403_p2), 523264   ;;  %v508_v43 = vlaneseq (!%p403_p2) }
   0x6   : > { %406 = sbr.rel (%p403_p2) target bundleno = 2945 (0xb81), region = 68  ;;  %p457_p3 = scmp.lt.s32.totalorder (!%p403_p2), %s1890_s29, 7  ;;  %1974 = vmatprep.subr.bf16.mxu0 (!%p403_p2), %v2097_v0  ;;  %v2099_v8 = vld [vmem:[%s2670_s6] sm:$0xff] (!%p403_p2)   ;;  %v2100_v9 = vld [vmem:[%s2670_s6 + $0x8] sm:$0xff] (!%p403_p2)   ;;  %v2102_v11 = vld [vmem:[%s2670_s6 + $0x18] sm:$0xff] (!%p403_p2)   ;;  %vm2204_vm2 = vmmov (!%p403_p2), 0  }
   0x7   : > { %1975 = vmatpush3.bf16.msra.mxu0 (!%p403_p2), %v2097_v0  ;;  %1982 = vmatprep.subr.bf16.mxu1 (!%p403_p2), %v2099_v8  ;;  %v1898_v12 = vld [vmem:[%s2673_s9] ss:$0 sm:$0xff] (!%p403_p2)  ;;  %v2330_v44 = vshrl.u32 (!%p403_p2), %v508_v43, 7  ;;  %vm920_vm3 = vcmask (!%p403_p2), 1043456   ;;  %vm916_vm4 = vcmask (!%p403_p2), 64512   ;;  %vm976_vm5 = vcmask (!%p403_p2), 130048  }
   0x8   : > { %1976 = vmatprep.subr.bf16.mxu0 (!%p403_p2), %v2098_v1  ;;  %1983 = vmatpush3.bf16.msra.mxu1 (!%p403_p2), %v2099_v8  ;;  %v2336_v46 = vld [vmem:[%s2675_s11] sm:$0x3f] (!%p403_p2) }
   0x9   : > { %1984 = vmatprep.subr.bf16.mxu1 (!%p403_p2), %v2100_v9  ;;  %v645_v45 = vsub.s32 (!%p403_p2), 0, %v2330_v44  ;;  %v794_v43 = vsub.s32 (!%p403_p2), 3, %v2330_v44 }
   0xb   : > { %1977 = vmatpush3.bf16.msra.mxu0 (!%p403_p2), %v2098_v1  ;;  %v646_v47 = vrot.slane (!%p403_p2), %v2336_v46, %v645_v45 }
   0xc   : > { %1985 = vmatpush3.bf16.msra.mxu1 (!%p403_p2), %v2100_v9 }
   0xd   : > { %s2679_s29 = smov (!%p457_p3, %s1890_s29), 7  ;;  %1986 = vmatprep.subr.bf16.mxu1 %v2101_v10 }
   0xe   : > { %s2295_s15 = sshll.u32 %s2679_s29, 3 }
   0xf   : > { %s466_s18 = scalar_lea.vmem %s2665_s1, %s2295_s15  ;;  %s2389_s29 = scalar_lea.vmem %s2664_s0, %s2295_s15 }
  0x10   : > { %v2301_v2 = vld [vmem:[%s466_s18] sm:$0xff]  ;;  %v2303_v3 = vld [vmem:[%s466_s18 + $0x8] sm:$0xff]  ;;  %v2305_v4 = vld [vmem:[%s466_s18 + $0x10] sm:$0xff]  ;;  %1987 = vmatpush3.bf16.msra.mxu1 %v2101_v10  ;;  %s2500_s20 = scalar_lea.vmem %s2676_s12, %s2295_s15  ;;  %s2645_s28 = scalar_lea.vmem %s2677_s13, %s2295_s15 }
  0x11   : > { %v533_v5 = vpack.c.bf16 %v2303_v3, %v2301_v2  ;;  %v2309_v6 = vld [vmem:[%s466_s18 + $0x18] sm:$0xff]  ;;  %1988 = vmatprep.subr.bf16.mxu1 %v2102_v11 }
  0x12   : > { %v534_v7 = vpack.c.bf16 %v2309_v6, %v2305_v4 }
  0x13   : > { %1978 = vmatprep.mubr.msk.bf16.mxu0 %vm557_vm0, %v533_v5 }
  0x14   : > { %1979 = vmatmul.mubr.msk.bf16.vlgmr.msra.gmra.mrb[0].mxu0 %vm557_vm0, %v534_v7  ;;  %1989 = vmatpush3.bf16.msra.mxu1 %v2102_v11 }
  0xe7   : > { %v1980_v13 = vpop.f32.mrb[0].mxu0 }
  0xe8   : > { %v607_v14 = vadd.f32 %v1980_v13, %v1898_v12  ;;  %v598_v15 = vpop.f32.mrb[1].mxu0 }
  0xe9   : > { %v599_v16 = vadd.f32 %v1898_v12, %v598_v15  ;;  %v1981_v17 = vpop.f32.mrb[2].mxu0 }
  0xea   : > { %v619_v18 = vmul.f32 0.70710677, %v607_v14  ;;  %v610_v19 = vadd.f32 %v1981_v17, %v1898_v12  ;;  %v601_v20 = vpop.f32.mrb[3].mxu0  ;;  %v615_v31 = vmul.f32 0.5, %v607_v14 }
  0xeb   : > { %v617_v21 = vmul.f32 0.70710677, %v599_v16  ;;  %v602_v22 = vadd.f32 %v1898_v12, %v601_v20  ;;  %v613_v34 = vmul.f32 0.5, %v599_v16  ;;  %v2103_v20 = vld [vmem:[%s2671_s7] sm:$0xff]  }
  0xec   : > { %2106 = verf.f32 %v619_v18  ;;  %v620_v23 = vmul.f32 0.70710677, %v610_v19  ;;  %v616_v32 = vmul.f32 0.5, %v610_v19  ;;  %1994 = vmatprep.subr.bf16.mxu0 %v2103_v20 }
  0xed   : > { %2108 = verf.f32 %v617_v21  ;;  %v618_v24 = vmul.f32 0.70710677, %v602_v22  ;;  %v614_v35 = vmul.f32 0.5, %v602_v22  ;;  %1995 = vmatpush3.bf16.msra.mxu0 %v2103_v20  ;;  %v2104_v21 = vld [vmem:[%s2671_s7 + $0x8] sm:$0xff]   ;;  %v2203_v22 = vmov 0.0  }
  0xee   : > { %2110 = verf.f32 %v620_v23  ;;  %1996 = vmatprep.subr.bf16.mxu0 %v2104_v21  ;;  %2008 = vmatprep.subr.bf16.mxu1 %v2203_v22  ;;  %v517_v23 = vld [vmem:[%s2672_s8 + $0x8] sm:$0xff] }
  0xef   : > { %2112 = verf.f32 %v618_v24  ;;  %v516_v24 = vld [vmem:[%s2672_s8] sm:$0xff] }
  0xf1   : > { %1997 = vmatpush3.bf16.msra.mxu0 %v2104_v21 }
  0xf2   : > { %2002 = vmatprep.subr.bf16.mxu0 %v2203_v22 }
  0xf6   : > { %v2107_v25 = vpop.eup %2106 }
  0xf7   : > { %v2109_v26 = vpop.eup %2108  ;;  %v627_v27 = vadd.f32 1.0, %v2107_v25  ;;  %v2205_v25 = vmov 0  }
  0xf8   : > { %v2111_v28 = vpop.eup %2110  ;;  %v625_v29 = vadd.f32 1.0, %v2109_v26  ;;  %2091 = vset.pattern.permute.xlu1 %v2205_v25  ;;  %2090 = vset.pattern.permute.xlu0 %v2205_v25  ;;  %v2378_v26 = vld [vmem:[%s2674_s10] sm:$0xff] }
  0xf9   : > { %v2113_v30 = vpop.eup %2112  ;;  %v628_v33 = vadd.f32 1.0, %v2111_v28  ;;  %v631_v37 = vmul.f32 %v627_v27, %v615_v31 }
  0xfa   : > { %v626_v36 = vadd.f32 1.0, %v2113_v30  ;;  %v629_v39 = vmul.f32 %v625_v29, %v613_v34 }
  0xfb   : > { %v632_v38 = vmul.f32 %v628_v33, %v616_v32 }
  0xfc   : > { %v630_v40 = vmul.f32 %v626_v36, %v614_v35 }
  0xfd   : > { %v634_v41 = vpack.c.bf16 %v632_v38, %v631_v37 }
  0xfe   : > { %v633_v42 = vpack.c.bf16 %v630_v40, %v629_v39  ;;  %v786_v39 = vsub.s32 2, %v2330_v44 }
 0x100   : > { %1990 = vmatprep.mubr.msk.bf16.mxu1 %vm671_vm1, %v633_v42  ;;  %v787_v42 = vrot.slane %v2336_v46, %v786_v39 }
 0x101   : > { %1991 = vmatmul.mubr.msk.bf16.vlgmr.msra.gmra.mrb[0].mxu1 %vm671_vm1, %v634_v41 }
 0x102   : > { %2010 = vmatprep.mubr.msk.bf16.mxu1 %vm2204_vm2, %v2203_v22 }
 0x1d4   : > { %v1992_v48 = vpop.f32.mrb[0].mxu1 }
 0x1d5   : > { %v721_v49 = vadd.f32 %v1992_v48, %v646_v47  ;;  %v712_v50 = vpop.f32.mrb[1].mxu1 }
 0x1d6   : > { %v713_v51 = vadd.f32 %v712_v50, %v646_v47  ;;  %v1993_v52 = vpop.f32.mrb[2].mxu1  ;;  %v795_v50 = vrot.slane %v2336_v46, %v794_v43 }
 0x1d7   : > { %v724_v53 = vadd.f32 %v1993_v52, %v646_v47  ;;  %v715_v54 = vpop.f32.mrb[3].mxu1  ;;  %v729_v55 = vadd.f32 %v721_v49, %v2305_v4 }
 0x1d8   : > { %v716_v56 = vadd.f32 %v715_v54, %v646_v47  ;;  %v727_v57 = vadd.f32 %v713_v51, %v2301_v2  ;;  %v2393_v54 = vld [vmem:[%s2389_s29] sm:$0xff] }
 0x1d9   : > { %v737_v58 = vsel %vm557_vm0, %v729_v55, 0.0  ;;  %v730_v59 = vadd.f32 %v724_v53, %v2309_v6 }
 0x1da   : > { %738 = vadd.xlane.f32.xlu1 %v737_v58  ;;  %v731_v60 = vsel %vm557_vm0, %v727_v57, 0.0  ;;  %v728_v61 = vadd.f32 %v716_v56, %v2303_v3 }
 0x1db   : > { %732 = vadd.xlane.f32.xlu0 %v731_v60  ;;  %v740_v62 = vsel %vm557_vm0, %v730_v59, 0.0 }
 0x1dc   : > { %v734_v63 = vsel %vm557_vm0, %v728_v61, 0.0 }
 0x1de   : > { %741 = vadd.xlane.f32.xlu1 %v740_v62 }
 0x1df   : > { %735 = vadd.xlane.f32.xlu0 %v734_v63 }
 0x267   : > { %v739_v0 = vpop.xlane.xlu1 %738 }
 0x268   : > { %v746_v1 = vmul.f32 0.03125, %v739_v0  ;;  %v733_v4 = vpop.xlane.xlu0 %732 }
 0x269   : > { %v744_v2 = vmul.f32 0.03125, %v733_v4  ;;  %v2419_v4 = vld [vmem:[%s2666_s2] sm:$0xff]  }
 0x26a   : > { %v2347_v5 = vsub.f32 %v729_v55, %v746_v1 }
 0x26b   : > { %v748_v7 = vsub.f32 %v727_v57, %v744_v2  ;;  %v742_v6 = vpop.xlane.xlu1 %741  ;;  %v2206_v2 = vmov 2  }
 0x26c   : > { %v747_v8 = vmul.f32 0.03125, %v742_v6  ;;  %v736_v9 = vpop.xlane.xlu0 %735  ;;  %v754_v14 = vmul.f32 %v2347_v5, %v2347_v5  ;;  %v2209_v6 = vmov 5  }
 0x26d   : > { %v745_v10 = vmul.f32 0.03125, %v736_v9  ;;  %v752_v11 = vmul.f32 %v748_v7, %v748_v7 }
 0x26e   : > { %v2349_v3 = vsub.f32 %v730_v59, %v747_v8  ;;  %v762_v16 = vsel %vm557_vm0, %v754_v14, 0.0  ;;  %v808_v8 = vsub.s32 1, %v2330_v44 }
 0x26f   : > { %v749_v12 = vsub.f32 %v728_v61, %v745_v10  ;;  %v756_v13 = vsel %vm557_vm0, %v752_v11, 0.0  ;;  %v910_v61 = vpack.c.bf16 %v2393_v54, %v2393_v54 }
 0x270   : > { %757 = vadd.xlane.f32.xlu0 %v756_v13  ;;  %v755_v18 = vmul.f32 %v2349_v3, %v2349_v3  ;;  %v2431_v9 = vrot.slane %v2336_v46, %v808_v8 }
 0x271   : > { %v753_v15 = vmul.f32 %v749_v12, %v749_v12  ;;  %v922_v1 = vsel %vm920_vm3, %v910_v61, 0 }
 0x272   : > { %v765_v19 = vsel %vm557_vm0, %v755_v18, 0.0 }
 0x273   : > { %v759_v17 = vsel %vm557_vm0, %v753_v15, 0.0 }
 0x274   : > { %763 = vadd.xlane.f32.xlu0 %v762_v16  ;;  %760 = vadd.xlane.f32.xlu1 %v759_v17 }
 0x278   : > { %766 = vadd.xlane.f32.xlu1 %v765_v19 }
 0x289   : > { %525 = vperm.xlu1 %2091, %v517_v23  }
 0x28a   : > { %520 = vperm.xlu0 %2090, %v516_v24  }
 0x28d   : > { %485 = vperm.xlu1 %2091, %v2378_v26  }
 0x291   : > { %2092 = vset.pattern.permute.xlu1 %v2206_v2 }
 0x292   : > { %493 = vperm.xlu1 %2092, %v2378_v26  }
 0x2fd   : > { %v758_v27 = vpop.xlane.xlu0 %757 }
 0x2fe   : > { %v768_v28 = vmul.f32 0.03125, %v758_v27 }
 0x300   : > { %v772_v29 = vadd.f32 1e-05, %v768_v28 }
 0x301   : > { %v761_v30 = vpop.xlane.xlu1 %760  ;;  %v764_v31 = vpop.xlane.xlu0 %763 }
 0x302   : > { %2114 = vrsqrt.f32 %v772_v29  ;;  %v769_v32 = vmul.f32 0.03125, %v761_v30  ;;  %v770_v33 = vmul.f32 0.03125, %v764_v31 }
 0x304   : > { %v773_v34 = vadd.f32 1e-05, %v769_v32  ;;  %v774_v35 = vadd.f32 1e-05, %v770_v33  ;;  %v2451_v33 = vld [vmem:[%s2389_s29 + $0x8] sm:$0xff] }
 0x305   : > { %v767_v36 = vpop.xlane.xlu1 %766 }
 0x306   : > { %2116 = vrsqrt.f32 %v773_v34  ;;  %v771_v37 = vmul.f32 0.03125, %v767_v36  ;;  %v1142_v36 = vpack.c.bf16 %v2451_v33, %v2451_v33 }
 0x307   : > { %2118 = vrsqrt.f32 %v774_v35 }
 0x308   : > { %v775_v38 = vadd.f32 1e-05, %v771_v37  ;;  %v1144_v39 = vsel %vm920_vm3, %v1142_v36, 0 }
 0x309   : > { %v2444_v16 = vpop.permute.xlu0 %520  ;;  %v2447_v19 = vpop.permute.xlu1 %525 }
 0x30a   : > { %2120 = vrsqrt.f32 %v775_v38  ;;  %v2458_v38 = vld [vmem:[%s2667_s3] sm:$0xf] }
 0x30c   : > { %v2115_v40 = vpop.eup %2114 }
 0x30d   : > { %v780_v41 = vmul.f32 %v2115_v40, %v748_v7  ;;  %v2208_v7 = vmov 4   ;;  %v2471_v40 = vpop.permute.xlu1 %485 }
 0x30f   : > { %v788_v49 = vmul.f32 %v787_v42, %v780_v41 }
 0x310   : > { %v2117_v45 = vpop.eup %2116 }
 0x311   : > { %v2119_v47 = vpop.eup %2118  ;;  %v781_v48 = vmul.f32 %v2117_v45, %v749_v12  ;;  %v2396_v57 = vadd.f32 %v795_v50, %v788_v49 }
 0x312   : > { %v782_v51 = vmul.f32 %v2119_v47, %v2347_v5  ;;  %v2207_v5 = vmov 3  }
 0x313   : > { %v789_v52 = vmul.f32 %v787_v42, %v781_v48  ;;  %2093 = vset.pattern.permute.xlu1 %v2207_v5 }
 0x314   : > { %v2121_v53 = vpop.eup %2120  ;;  %v790_v55 = vmul.f32 %v787_v42, %v782_v51  ;;  %497 = vperm.xlu1 %2093, %v2378_v26  }
 0x315   : > { %v783_v56 = vmul.f32 %v2121_v53, %v2349_v3  ;;  %v2398_v58 = vadd.f32 %v795_v50, %v789_v52  ;;  %v2210_v53 = vmov 1  }
 0x316   : > { %v2405_v62 = vadd.f32 %v795_v50, %v790_v55 }
 0x317   : > { %v791_v59 = vmul.f32 %v787_v42, %v783_v56  ;;  %v800_v60 = vpack.c.bf16 %v2398_v58, %v2396_v57 }
 0x318   : > { %2094 = vset.pattern.permute.xlu1 %v2208_v7 }
 0x319   : > { %1998 = vmatprep.mubr.msk.bf16.mxu0 %vm557_vm0, %v800_v60  ;;  %v2407_v63 = vadd.f32 %v795_v50, %v791_v59  ;;  %501 = vperm.xlu1 %2094, %v2378_v26  }
 0x31b   : > { %v801_v0 = vpack.c.bf16 %v2407_v63, %v2405_v62 }
 0x31d   : > { %1999 = vmatmul.mubr.msk.bf16.vlgmr.msra.gmra.mrb[4].mxu0 %vm557_vm0, %v801_v0  ;;  %2095 = vset.pattern.permute.xlu1 %v2209_v6 }
 0x31e   : > { %2003 = vmatpush3.bf16.msra.mxu0 %v922_v1  ;;  %2004 = vmatprep.mubr.msk.bf16.mxu0 %vm2204_vm2, %v2203_v22 }
 0x31f   : > { %2014 = vmatprep.subr.bf16.mxu0 %v2203_v22  ;;  %505 = vperm.xlu1 %2095, %v2378_v26  }
 0x323   : > { %2096 = vset.pattern.permute.xlu1 %v2210_v53 }
 0x324   : > { %489 = vperm.xlu1 %2096, %v2378_v26  }
 0x325   : > { %2005 = vmatmul.mubr.msk.bf16.vlgmr.msra.gmra.mrb[8].mxu0 %vm916_vm4, %v2419_v4 }
 0x326   : > { %2016 = vmatprep.mubr.msk.bf16.mxu0 %vm2204_vm2, %v2203_v22 }
 0x3f0   : > { %v2000_v10 = vpop.f32.mrb[4].mxu0 }
 0x3f1   : > { %v2434_v11 = vadd.f32 %v2000_v10, %v2431_v9  ;;  %v2436_v3 = vpop.f32.mrb[5].mxu0 }
 0x3f2   : > { %v2001_v12 = vpop.f32.mrb[6].mxu0  ;;  %v863_v6 = vadd.f32 %v2436_v3, %v2431_v9 }
 0x3f3   : > { %v2439_v13 = vadd.f32 %v2001_v12, %v2431_v9  ;;  %v865_v14 = vpop.f32.mrb[7].mxu0 }
 0x3f4   : > { %v2442_v15 = vadd.f32 %v865_v14, %v2431_v9  ;;  %v1913_v12 = vmul.f32 -1.442695, %v863_v6 }
 0x3f8   : > { %v958_v17 = vpop.f32.mrb[8].mxu0 }
 0x3f9   : > { %v959_v46 = vadd.f32 %v958_v17, %v2444_v16  ;;  %v2006_v18 = vpop.f32.mrb[9].mxu0 }
 0x3fa   : > { %v961_v20 = vpop.f32.mrb[10].mxu0 }
 0x3fb   : > { %v967_v21 = vmul.f32 0.70710677, %v959_v46  ;;  %v962_v23 = vadd.f32 %v961_v20, %v2447_v19  ;;  %v2007_v24 = vpop.f32.mrb[11].mxu0  ;;  %v965_v30 = vmul.f32 0.5, %v959_v46 }
 0x3fd   : > { %2122 = verf.f32 %v967_v21  ;;  %v968_v25 = vmul.f32 0.70710677, %v962_v23  ;;  %v966_v31 = vmul.f32 0.5, %v962_v23 }
 0x3ff   : > { %2124 = verf.f32 %v968_v25 }
 0x407   : > { %v2123_v27 = vpop.eup %2122 }
 0x408   : > { %v971_v28 = vadd.f32 1.0, %v2123_v27 }
 0x409   : > { %v2125_v29 = vpop.eup %2124 }
 0x40a   : > { %v972_v32 = vadd.f32 1.0, %v2125_v29  ;;  %v973_v34 = vmul.f32 %v971_v28, %v965_v30 }
 0x40c   : > { %v974_v35 = vmul.f32 %v972_v32, %v966_v31 }
 0x40e   : > { %v975_v37 = vpack.c.bf16 %v974_v35, %v973_v34 }
 0x410   : > { %2009 = vmatpush3.bf16.msra.mxu1 %v975_v37  ;;  %v2482_v37 = vpop.permute.xlu1 %493 }
 0x411   : > { %2020 = vmatprep.subr.bf16.mxu1 %v2203_v22 }
 0x413   : > { %2011 = vmatmul.mubr.msk.bf16.vlgmr.msra.gmra.mrb[4].mxu1 %vm976_vm5, %v2458_v38 }
 0x414   : > { %2021 = vmatpush3.bf16.msra.mxu1 %v1144_v39  ;;  %2022 = vmatprep.mubr.msk.bf16.mxu1 %vm2204_vm2, %v2203_v22 }
 0x415   : > { %2032 = vmatprep.subr.bf16.mxu1 %v2203_v22 }
 0x41b   : > { %2023 = vmatmul.mubr.msk.bf16.vlgmr.msra.gmra.mrb[8].mxu1 %vm916_vm4, %v2419_v4 }
 0x41c   : > { %2034 = vmatprep.mubr.msk.bf16.mxu1 %vm2204_vm2, %v2203_v22 }
 0x4e6   : > { %v1014_v41 = vpop.f32.mrb[4].mxu1 }
 0x4e7   : > { %v1015_v42 = vadd.f32 %v1014_v41, %v2471_v40  ;;  %v2012_v43 = vpop.f32.mrb[5].mxu1 }
 0x4e8   : > { %v1017_v45 = vpop.f32.mrb[6].mxu1  ;;  %v2484_v43 = vpop.permute.xlu1 %497 }
 0x4e9   : > { %v1020_v47 = vadd.f32 %v1015_v42, %v2393_v54  ;;  %v2013_v48 = vpop.f32.mrb[7].mxu1 }
 0x4eb   : > { %v1021_v49 = vsel %vm557_vm0, %v1020_v47, 0.0 }
 0x4ec   : > { %v1022_v50 = vrot.slane %v1021_v49, 4 }
 0x4ee   : > { %v1023_v51 = vadd.f32 %v1022_v50, %v1021_v49  ;;  %v1180_v52 = vpop.f32.mrb[8].mxu1 }
 0x4ef   : > { %v1181_v55 = vadd.f32 %v1180_v52, %v2444_v16  ;;  %v2024_v56 = vpop.f32.mrb[9].mxu1 }
 0x4f0   : > { %v1024_v59 = vrot.slane %v1023_v51, 2  ;;  %v1183_v60 = vpop.f32.mrb[10].mxu1 }
 0x4f1   : > { %v1189_v61 = vmul.f32 0.70710677, %v1181_v55  ;;  %v1184_v0 = vadd.f32 %v1183_v60, %v2447_v19  ;;  %v2025_v1 = vpop.f32.mrb[11].mxu1  ;;  %v1187_v21 = vmul.f32 0.5, %v1181_v55 }
 0x4f2   : > { %v1025_v54 = vadd.f32 %v1024_v59, %v1023_v51 }
 0x4f3   : > { %2126 = verf.f32 %v1189_v61  ;;  %v1190_v2 = vmul.f32 0.70710677, %v1184_v0  ;;  %v1188_v23 = vmul.f32 0.5, %v1184_v0 }
 0x4f4   : > { %v1026_v5 = vrot.slane %v1025_v54, 1 }
 0x4f5   : > { %2128 = verf.f32 %v1190_v2 }
 0x4f6   : > { %v1027_v7 = vadd.f32 %v1026_v5, %v1025_v54  ;;  %2130 = vpow2.f32 %v1913_v12 }
 0x4f8   : > { %v1029_v8 = vmul.f32 0.125, %v1027_v7 }
 0x4fa   : > { %v1030_v10 = vsub.f32 %v1020_v47, %v1029_v8 }
 0x4fc   : > { %v1031_v14 = vmul.f32 %v1030_v10, %v1030_v10 }
 0x4fd   : > { %v2127_v26 = vpop.eup %2126 }
 0x4fe   : > { %v1032_v17 = vsel %vm557_vm0, %v1031_v14, 0.0  ;;  %v1193_v46 = vadd.f32 1.0, %v2127_v26  ;;  %v2491_v14 = vpop.permute.xlu1 %501 }
 0x4ff   : > { %v2129_v18 = vpop.eup %2128  ;;  %v1033_v20 = vrot.slane %v1032_v17, 4 }
 0x500   : > { %v1194_v24 = vadd.f32 1.0, %v2129_v18  ;;  %v1195_v27 = vmul.f32 %v1193_v46, %v1187_v21  ;;  %v2131_v32 = vpop.eup %2130 }
 0x501   : > { %v1034_v25 = vadd.f32 %v1033_v20, %v1032_v17  ;;  %v889_v35 = vadd.f32 1.0, %v2131_v32 }
 0x502   : > { %v1196_v28 = vmul.f32 %v1194_v24, %v1188_v23  ;;  %v2493_v46 = vpop.permute.xlu1 %505  ;;  %v2509_v24 = vld [vmem:[%s2668_s4] sm:$0xf] }
 0x503   : > { %v1035_v29 = vrot.slane %v1034_v25, 2 }
 0x504   : > { %v1197_v30 = vpack.c.bf16 %v1196_v28, %v1195_v27 }
 0x505   : > { %v1036_v9 = vadd.f32 %v1035_v29, %v1034_v25  ;;  %v2513_v25 = vld [vmem:[%s2389_s29 + $0x10] sm:$0xff] }
 0x506   : > { %v1356_v27 = vpack.c.bf16 %v2513_v25, %v2513_v25  ;;  %v2532_v29 = vpop.permute.xlu1 %489 }
 0x507   : > { %v1037_v3 = vrot.slane %v1036_v9, 1 }
 0x508   : > { %v1358_v28 = vsel %vm920_vm3, %v1356_v27, 0 }
 0x509   : > { %v1038_v31 = vadd.f32 %v1037_v3, %v1036_v9 }
 0x50b   : > { %v1039_v34 = vmul.f32 0.125, %v1038_v31 }
 0x50d   : > { %v1040_v36 = vadd.f32 1e-05, %v1039_v34 }
 0x50f   : > { %2132 = vrsqrt.f32 %v1040_v36 }
 0x510   : > { %2134 = vrcp.f32 %v889_v35 }
 0x519   : > { %v2133_v39 = vpop.eup %2132 }
 0x51a   : > { %v1042_v41 = vmul.f32 %v2133_v39, %v1030_v10  ;;  %v2135_v42 = vpop.eup %2134 }
 0x51b   : > { %v901_v47 = vmul.f32 %v2135_v42, %v2396_v57 }
 0x51c   : > { %v1043_v45 = vmul.f32 %v1042_v41, %v2482_v37 }
 0x51e   : > { %v1044_v48 = vadd.f32 %v1043_v45, %v2484_v43 }
 0x520   : > { %v1045_v49 = vadd.f32 %v1044_v48, %v901_v47 }
 0x522   : > { %v1046_v50 = vsel %vm557_vm0, %v1045_v49, 0.0 }
 0x523   : > { %v1047_v51 = vrot.slane %v1046_v50, 4 }
 0x525   : > { %v1048_v52 = vadd.f32 %v1047_v51, %v1046_v50 }
 0x527   : > { %v1049_v53 = vrot.slane %v1048_v52, 2 }
 0x529   : > { %v1050_v55 = vadd.f32 %v1049_v53, %v1048_v52 }
 0x52b   : > { %v1051_v56 = vrot.slane %v1050_v55, 1 }
 0x52d   : > { %v1052_v59 = vadd.f32 %v1051_v56, %v1050_v55 }
 0x52f   : > { %v1053_v60 = vmul.f32 0.125, %v1052_v59 }
 0x531   : > { %v1054_v61 = vsub.f32 %v1045_v49, %v1053_v60 }
 0x533   : > { %v1055_v0 = vmul.f32 %v1054_v61, %v1054_v61 }
 0x535   : > { %v1056_v1 = vsel %vm557_vm0, %v1055_v0, 0.0 }
 0x536   : > { %v1057_v54 = vrot.slane %v1056_v1, 4 }
 0x538   : > { %v1058_v2 = vadd.f32 %v1057_v54, %v1056_v1 }
 0x53a   : > { %v1059_v5 = vrot.slane %v1058_v2, 2 }
 0x53c   : > { %v1060_v7 = vadd.f32 %v1059_v5, %v1058_v2 }
 0x53e   : > { %v1061_v6 = vrot.slane %v1060_v7, 1 }
 0x540   : > { %v1062_v8 = vadd.f32 %v1061_v6, %v1060_v7 }
 0x542   : > { %v1063_v10 = vmul.f32 0.125, %v1062_v8 }
 0x544   : > { %v1064_v12 = vadd.f32 1e-05, %v1063_v10  ;;  %v1914_v10 = vmul.f32 -1.442695, %v2442_v15 }
 0x546   : > { %2136 = vrsqrt.f32 %v1064_v12 }
 0x550   : > { %v2137_v26 = vpop.eup %2136 }
 0x551   : > { %v1066_v17 = vmul.f32 %v2137_v26, %v1054_v61 }
 0x553   : > { %v1067_v18 = vmul.f32 %v1066_v17, %v2491_v14 }
 0x555   : > { %v1068_v20 = vadd.f32 %v1067_v18, %v2493_v46 }
 0x557   : > { %1123 = vst.msk [vmem:[%s2500_s20] sm:$0xff] %vm557_vm0, %v1068_v20  ;;  %v1069_v21 = vpack.c.bf16 %v1068_v20, %v1068_v20 }
 0x559   : > { %v1074_v23 = vsel %vm920_vm3, %v1069_v21, 0 }
 0x55a   : > { %2015 = vmatpush3.bf16.msra.mxu0 %v1074_v23 }
 0x55b   : > { %2026 = vmatprep.subr.bf16.mxu0 %v2203_v22 }
 0x55d   : > { %2017 = vmatmul.mubr.msk.bf16.vlgmr.msra.gmra.mrb[12].mxu0 %vm916_vm4, %v2509_v24 }
 0x55e   : > { %2027 = vmatpush3.bf16.msra.mxu0 %v1197_v30  ;;  %2028 = vmatprep.mubr.msk.bf16.mxu0 %vm2204_vm2, %v2203_v22 }
 0x55f   : > { %2038 = vmatprep.subr.bf16.mxu0 %v2203_v22 }
 0x565   : > { %2029 = vmatmul.mubr.msk.bf16.vlgmr.msra.gmra.mrb[16].mxu0 %vm976_vm5, %v2458_v38 }
 0x566   : > { %2039 = vmatpush3.bf16.msra.mxu0 %v1358_v28  ;;  %2040 = vmatprep.mubr.msk.bf16.mxu0 %vm2204_vm2, %v2203_v22 }
 0x567   : > { %2050 = vmatprep.subr.bf16.mxu0 %v2203_v22 }
 0x56d   : > { %2041 = vmatmul.mubr.msk.bf16.vlgmr.msra.gmra.mrb[20].mxu0 %vm916_vm4, %v2419_v4 }
 0x56e   : > { %2052 = vmatprep.mubr.msk.bf16.mxu0 %vm2204_vm2, %v2203_v22 }
 0x630   : > { %v1110_v30 = vpop.f32.mrb[12].mxu0 }
 0x631   : > { %v1111_v9 = vadd.f32 %v1110_v30, %v2532_v29  ;;  %v2018_v3 = vpop.f32.mrb[13].mxu0 }
 0x632   : > { %v1113_v31 = vpop.f32.mrb[14].mxu0 }
 0x633   : > { %v1921_v32 = vmul.f32 -1.442695, %v1111_v9  ;;  %v2019_v34 = vpop.f32.mrb[15].mxu0 }
 0x635   : > { %2138 = vpow2.f32 %v1921_v32 }
 0x638   : > { %v1232_v35 = vpop.f32.mrb[16].mxu0 }
 0x639   : > { %v1233_v36 = vadd.f32 %v1232_v35, %v2471_v40  ;;  %v2030_v39 = vpop.f32.mrb[17].mxu0 }
 0x63a   : > { %v1235_v41 = vpop.f32.mrb[18].mxu0 }
 0x63b   : > { %v1238_v42 = vadd.f32 %v1233_v36, %v2451_v33  ;;  %v2031_v45 = vpop.f32.mrb[19].mxu0 }
 0x63d   : > { %v1239_v47 = vsel %vm557_vm0, %v1238_v42, 0.0 }
 0x63e   : > { %v1240_v48 = vrot.slane %v1239_v47, 4 }
 0x63f   : > { %v2139_v49 = vpop.eup %2138 }
 0x640   : > { %v1119_v50 = vadd.f32 1.0, %v2139_v49  ;;  %v1241_v51 = vadd.f32 %v1240_v48, %v1239_v47  ;;  %v1394_v52 = vpop.f32.mrb[20].mxu0 }
 0x641   : > { %v1395_v53 = vadd.f32 %v1394_v52, %v2444_v16  ;;  %v2042_v55 = vpop.f32.mrb[21].mxu0 }
 0x642   : > { %2140 = vrcp.f32 %v1119_v50  ;;  %v1242_v56 = vrot.slane %v1241_v51, 2  ;;  %v1397_v59 = vpop.f32.mrb[22].mxu0 }
 0x643   : > { %v1403_v60 = vmul.f32 0.70710677, %v1395_v53  ;;  %v1398_v61 = vadd.f32 %v1397_v59, %v2447_v19  ;;  %v2043_v0 = vpop.f32.mrb[23].mxu0  ;;  %v1401_v30 = vmul.f32 0.5, %v1395_v53 }
 0x644   : > { %v1243_v1 = vadd.f32 %v1242_v56, %v1241_v51 }
 0x645   : > { %2142 = verf.f32 %v1403_v60  ;;  %v1404_v33 = vmul.f32 0.70710677, %v1398_v61  ;;  %v1402_v9 = vmul.f32 0.5, %v1398_v61 }
 0x646   : > { %v1244_v54 = vrot.slane %v1243_v1, 1 }
 0x647   : > { %2144 = verf.f32 %v1404_v33 }
 0x648   : > { %v1245_v2 = vadd.f32 %v1244_v54, %v1243_v1  ;;  %2146 = vpow2.f32 %v1914_v10 }
 0x64a   : > { %v1246_v5 = vmul.f32 0.125, %v1245_v2 }
 0x64c   : > { %v2141_v7 = vpop.eup %2140  ;;  %v1247_v6 = vsub.f32 %v1238_v42, %v1246_v5 }
 0x64d   : > { %v1122_v8 = vmul.f32 %v2141_v7, %v1068_v20 }
 0x64e   : > { %v1248_v12 = vmul.f32 %v1247_v6, %v1247_v6 }
 0x64f   : > { %v2143_v26 = vpop.eup %2142  ;;  %v2542_v17 = vadd.f32 %v1122_v8, %v2396_v57 }
 0x650   : > { %v1249_v18 = vsel %vm557_vm0, %v1248_v12, 0.0  ;;  %v1407_v21 = vadd.f32 1.0, %v2143_v26 }
 0x651   : > { %v2145_v23 = vpop.eup %2144  ;;  %v1250_v27 = vrot.slane %v1249_v18, 4  ;;  %v1125_v28 = vsel %vm557_vm0, %v2542_v17, 0.0 }
 0x652   : > { %v1408_v3 = vadd.f32 1.0, %v2145_v23  ;;  %1126 = vadd.xlane.f32.xlu1 %v1125_v28  ;;  %v1409_v15 = vmul.f32 %v1407_v21, %v1401_v30  ;;  %v2147_v39 = vpop.eup %2146 }
 0x653   : > { %v1251_v20 = vadd.f32 %v1250_v27, %v1249_v18  ;;  %v890_v42 = vadd.f32 1.0, %v2147_v39 }
 0x654   : > { %v1410_v31 = vmul.f32 %v1408_v3, %v1402_v9 }
 0x655   : > { %v1252_v32 = vrot.slane %v1251_v20, 2 }
 0x656   : > { %v1411_v34 = vpack.c.bf16 %v1410_v31, %v1409_v15 }
 0x657   : > { %v1253_v57 = vadd.f32 %v1252_v32, %v1251_v20  ;;  %v2559_v20 = vld [vmem:[%s2389_s29 + $0x18] sm:$0xff] }
 0x658   : > { %v1570_v15 = vpack.c.bf16 %v2559_v20, %v2559_v20 }
 0x659   : > { %v1254_v35 = vrot.slane %v1253_v57, 1 }
 0x65a   : > { %v1572_v31 = vsel %vm920_vm3, %v1570_v15, 0 }
 0x65b   : > { %v1255_v36 = vadd.f32 %v1254_v35, %v1253_v57 }
 0x65d   : > { %v1256_v41 = vmul.f32 0.125, %v1255_v36 }
 0x65f   : > { %v1257_v45 = vadd.f32 1e-05, %v1256_v41 }
 0x661   : > { %2148 = vrsqrt.f32 %v1257_v45 }
 0x662   : > { %2150 = vrcp.f32 %v890_v42 }
 0x66b   : > { %v2149_v47 = vpop.eup %2148 }
 0x66c   : > { %v1259_v48 = vmul.f32 %v2149_v47, %v1247_v6  ;;  %v2151_v49 = vpop.eup %2150 }
 0x66d   : > { %v902_v51 = vmul.f32 %v2151_v49, %v2398_v58 }
 0x66e   : > { %v1260_v50 = vmul.f32 %v1259_v48, %v2482_v37 }
 0x670   : > { %v1261_v52 = vadd.f32 %v1260_v50, %v2484_v43 }
 0x672   : > { %v1262_v53 = vadd.f32 %v1261_v52, %v902_v51 }
 0x674   : > { %v1263_v55 = vsel %vm557_vm0, %v1262_v53, 0.0 }
 0x675   : > { %v1264_v56 = vrot.slane %v1263_v55, 4 }
 0x677   : > { %v1265_v59 = vadd.f32 %v1264_v56, %v1263_v55 }
 0x679   : > { %v1266_v60 = vrot.slane %v1265_v59, 2 }
 0x67b   : > { %v1267_v61 = vadd.f32 %v1266_v60, %v1265_v59 }
 0x67d   : > { %v1268_v0 = vrot.slane %v1267_v61, 1 }
 0x67f   : > { %v1269_v1 = vadd.f32 %v1268_v0, %v1267_v61 }
 0x681   : > { %v1270_v33 = vmul.f32 0.125, %v1269_v1 }
 0x683   : > { %v1271_v54 = vsub.f32 %v1262_v53, %v1270_v33 }
 0x685   : > { %v1272_v2 = vmul.f32 %v1271_v54, %v1271_v54 }
 0x687   : > { %v1273_v5 = vsel %vm557_vm0, %v1272_v2, 0.0 }
 0x688   : > { %v1274_v7 = vrot.slane %v1273_v5, 4 }
 0x68a   : > { %v1275_v6 = vadd.f32 %v1274_v7, %v1273_v5 }
 0x68c   : > { %v1276_v8 = vrot.slane %v1275_v6, 2 }
 0x68e   : > { %v1277_v10 = vadd.f32 %v1276_v8, %v1275_v6 }
 0x690   : > { %v1278_v12 = vrot.slane %v1277_v10, 1 }
 0x692   : > { %v1279_v26 = vadd.f32 %v1278_v12, %v1277_v10 }
 0x694   : > { %v1280_v18 = vmul.f32 0.125, %v1279_v26 }
 0x696   : > { %v1281_v21 = vadd.f32 1e-05, %v1280_v18 }
 0x698   : > { %2152 = vrsqrt.f32 %v1281_v21 }
 0x6a2   : > { %v2153_v23 = vpop.eup %2152 }
 0x6a3   : > { %v1283_v27 = vmul.f32 %v2153_v23, %v1271_v54 }
 0x6a5   : > { %v1284_v28 = vmul.f32 %v1283_v27, %v2491_v14 }
 0x6a7   : > { %v1285_v30 = vadd.f32 %v1284_v28, %v2493_v46 }
 0x6a9   : > { %v1286_v9 = vpack.c.bf16 %v1285_v30, %v1285_v30  ;;  %1337 = vst.msk [vmem:[%s2500_s20 + $0x8] sm:$0xff] %vm557_vm0, %v1285_v30 }
 0x6ab   : > { %v1288_v3 = vsel %vm920_vm3, %v1286_v9, 0 }
 0x6ac   : > { %2033 = vmatpush3.bf16.msra.mxu1 %v1288_v3 }
 0x6ad   : > { %2044 = vmatprep.subr.bf16.mxu1 %v2203_v22 }
 0x6af   : > { %2035 = vmatmul.mubr.msk.bf16.vlgmr.msra.gmra.mrb[12].mxu1 %vm916_vm4, %v2509_v24 }
 0x6b0   : > { %2045 = vmatpush3.bf16.msra.mxu1 %v1411_v34  ;;  %2046 = vmatprep.mubr.msk.bf16.mxu1 %vm2204_vm2, %v2203_v22 }
 0x6b1   : > { %2056 = vmatprep.subr.bf16.mxu1 %v2203_v22 }
 0x6b7   : > { %2047 = vmatmul.mubr.msk.bf16.vlgmr.msra.gmra.mrb[16].mxu1 %vm976_vm5, %v2458_v38 }
 0x6b8   : > { %2057 = vmatpush3.bf16.msra.mxu1 %v1572_v31  ;;  %2058 = vmatprep.mubr.msk.bf16.mxu1 %vm2204_vm2, %v2203_v22 }
 0x6b9   : > { %2068 = vmatprep.subr.bf16.mxu1 %v2203_v22 }
 0x6bf   : > { %2059 = vmatmul.mubr.msk.bf16.vlgmr.msra.gmra.mrb[20].mxu1 %vm916_vm4, %v2419_v4 }
 0x6c0   : > { %2070 = vmatprep.mubr.msk.bf16.mxu1 %vm2204_vm2, %v2203_v22 }
 0x782   : > { %v1324_v32 = vpop.f32.mrb[12].mxu1 }
 0x783   : > { %v1325_v34 = vadd.f32 %v1324_v32, %v2532_v29  ;;  %v2036_v57 = vpop.f32.mrb[13].mxu1 }
 0x784   : > { %v1327_v35 = vpop.f32.mrb[14].mxu1 }
 0x785   : > { %v1925_v36 = vmul.f32 -1.442695, %v1325_v34  ;;  %v2037_v39 = vpop.f32.mrb[15].mxu1 }
 0x787   : > { %2154 = vpow2.f32 %v1925_v36 }
 0x78a   : > { %v1446_v41 = vpop.f32.mrb[16].mxu1 }
 0x78b   : > { %v1447_v42 = vadd.f32 %v1446_v41, %v2471_v40  ;;  %v2048_v45 = vpop.f32.mrb[17].mxu1 }
 0x78c   : > { %v1449_v47 = vpop.f32.mrb[18].mxu1 }
 0x78d   : > { %v1452_v48 = vadd.f32 %v1447_v42, %v2513_v25  ;;  %v2049_v49 = vpop.f32.mrb[19].mxu1 }
 0x78f   : > { %v1453_v4 = vsel %vm557_vm0, %v1452_v48, 0.0 }
 0x790   : > { %v1454_v50 = vrot.slane %v1453_v4, 4 }
 0x791   : > { %v2155_v51 = vpop.eup %2154 }
 0x792   : > { %v1333_v52 = vadd.f32 1.0, %v2155_v51  ;;  %v1455_v53 = vadd.f32 %v1454_v50, %v1453_v4  ;;  %v1608_v55 = vpop.f32.mrb[20].mxu1 }
 0x793   : > { %v1609_v56 = vadd.f32 %v1608_v55, %v2444_v16  ;;  %v2060_v59 = vpop.f32.mrb[21].mxu1  ;;  %v1915_v16 = vmul.f32 -1.442695, %v2434_v11 }
 0x794   : > { %2156 = vrcp.f32 %v1333_v52  ;;  %v1456_v60 = vrot.slane %v1455_v53, 2  ;;  %v1611_v61 = vpop.f32.mrb[22].mxu1 }
 0x795   : > { %v1617_v0 = vmul.f32 0.70710677, %v1609_v56  ;;  %v1612_v1 = vadd.f32 %v1611_v61, %v2447_v19  ;;  %v2061_v33 = vpop.f32.mrb[23].mxu1  ;;  %v1615_v9 = vmul.f32 0.5, %v1609_v56 }
 0x796   : > { %v1457_v54 = vadd.f32 %v1456_v60, %v1455_v53 }
 0x797   : > { %2158 = verf.f32 %v1617_v0  ;;  %v1618_v25 = vmul.f32 0.70710677, %v1612_v1  ;;  %v1616_v3 = vmul.f32 0.5, %v1612_v1 }
 0x798   : > { %v1458_v2 = vrot.slane %v1457_v54, 1 }
 0x799   : > { %2160 = verf.f32 %v1618_v25 }
 0x79a   : > { %v1459_v5 = vadd.f32 %v1458_v2, %v1457_v54  ;;  %2162 = vpow2.f32 %v1915_v16 }
 0x79c   : > { %v1460_v7 = vmul.f32 0.125, %v1459_v5 }
 0x79e   : > { %v2157_v6 = vpop.eup %2156  ;;  %v1461_v8 = vsub.f32 %v1452_v48, %v1460_v7 }
 0x79f   : > { %v1336_v10 = vmul.f32 %v2157_v6, %v1285_v30 }
 0x7a0   : > { %v1462_v12 = vmul.f32 %v1461_v8, %v1461_v8 }
 0x7a1   : > { %v2159_v26 = vpop.eup %2158  ;;  %v2586_v18 = vadd.f32 %v1336_v10, %v2398_v58 }
 0x7a2   : > { %v1463_v19 = vsel %vm557_vm0, %v1462_v12, 0.0  ;;  %v1621_v21 = vadd.f32 1.0, %v2159_v26 }
 0x7a3   : > { %v2161_v23 = vpop.eup %2160  ;;  %v1464_v27 = vrot.slane %v1463_v19, 4  ;;  %v1339_v28 = vsel %vm557_vm0, %v2586_v18, 0.0 }
 0x7a4   : > { %v1622_v15 = vadd.f32 1.0, %v2161_v23  ;;  %1340 = vadd.xlane.f32.xlu0 %v1339_v28  ;;  %v1623_v11 = vmul.f32 %v1621_v21, %v1615_v9  ;;  %v2163_v36 = vpop.eup %2162 }
 0x7a5   : > { %v1465_v30 = vadd.f32 %v1464_v27, %v1463_v19  ;;  %v891_v41 = vadd.f32 1.0, %v2163_v36 }
 0x7a6   : > { %v1624_v31 = vmul.f32 %v1622_v15, %v1616_v3 }
 0x7a7   : > { %v1466_v32 = vrot.slane %v1465_v30, 2 }
 0x7a8   : > { %v1625_v34 = vpack.c.bf16 %v1624_v31, %v1623_v11 }
 0x7a9   : > { %v1467_v58 = vadd.f32 %v1466_v32, %v1465_v30 }
 0x7ab   : > { %v1468_v57 = vrot.slane %v1467_v58, 1 }
 0x7ad   : > { %v1469_v35 = vadd.f32 %v1468_v57, %v1467_v58 }
 0x7af   : > { %v1470_v39 = vmul.f32 0.125, %v1469_v35 }
 0x7b1   : > { %v1471_v42 = vadd.f32 1e-05, %v1470_v39 }
 0x7b3   : > { %2164 = vrsqrt.f32 %v1471_v42 }
 0x7b4   : > { %2166 = vrcp.f32 %v891_v41 }
 0x7bd   : > { %v2165_v45 = vpop.eup %2164 }
 0x7be   : > { %v1473_v47 = vmul.f32 %v2165_v45, %v1461_v8  ;;  %v2167_v48 = vpop.eup %2166 }
 0x7bf   : > { %v903_v4 = vmul.f32 %v2167_v48, %v2405_v62 }
 0x7c0   : > { %v1474_v49 = vmul.f32 %v1473_v47, %v2482_v37  ;;  %v1127_v47 = vpop.xlane.xlu1 %1126 }
 0x7c2   : > { %v1475_v50 = vadd.f32 %v1474_v49, %v2484_v43 }
 0x7c4   : > { %v1476_v51 = vadd.f32 %v1475_v50, %v903_v4  ;;  %v1128_v4 = vmul.f32 0.03125, %v1127_v47 }
 0x7c6   : > { %v1477_v52 = vsel %vm557_vm0, %v1476_v51, 0.0 }
 0x7c7   : > { %v1478_v53 = vrot.slane %v1477_v52, 4 }
 0x7c9   : > { %v1479_v55 = vadd.f32 %v1478_v53, %v1477_v52  ;;  %v2613_v52 = vsub.f32 %v2542_v17, %v1128_v4  ;;  %v1916_v53 = vmul.f32 -1.442695, %v2439_v13 }
 0x7cb   : > { %v1480_v56 = vrot.slane %v1479_v55, 2 }
 0x7cd   : > { %v1481_v59 = vadd.f32 %v1480_v56, %v1479_v55 }
 0x7cf   : > { %v1482_v60 = vrot.slane %v1481_v59, 1 }
 0x7d1   : > { %v1483_v61 = vadd.f32 %v1482_v60, %v1481_v59 }
 0x7d3   : > { %v1484_v0 = vmul.f32 0.125, %v1483_v61 }
 0x7d5   : > { %v1485_v1 = vsub.f32 %v1476_v51, %v1484_v0  ;;  %v1130_v0 = vmul.f32 %v2613_v52, %v2613_v52 }
 0x7d7   : > { %v1486_v33 = vmul.f32 %v1485_v1, %v1485_v1  ;;  %v1131_v17 = vsel %vm557_vm0, %v1130_v0, 0.0 }
 0x7d9   : > { %v1487_v54 = vsel %vm557_vm0, %v1486_v33, 0.0 }
 0x7da   : > { %v1488_v25 = vrot.slane %v1487_v54, 4 }
 0x7dc   : > { %v1489_v2 = vadd.f32 %v1488_v25, %v1487_v54 }
 0x7de   : > { %v1490_v5 = vrot.slane %v1489_v2, 2 }
 0x7e0   : > { %v1491_v7 = vadd.f32 %v1490_v5, %v1489_v2 }
 0x7e2   : > { %v1492_v6 = vrot.slane %v1491_v7, 1 }
 0x7e4   : > { %v1493_v8 = vadd.f32 %v1492_v6, %v1491_v7 }
 0x7e6   : > { %v1494_v10 = vmul.f32 0.125, %v1493_v8 }
 0x7e8   : > { %v1495_v16 = vadd.f32 1e-05, %v1494_v10 }
 0x7ea   : > { %2168 = vrsqrt.f32 %v1495_v16 }
 0x7f4   : > { %v2169_v12 = vpop.eup %2168 }
 0x7f5   : > { %v1497_v26 = vmul.f32 %v2169_v12, %v1485_v1 }
 0x7f7   : > { %v1498_v19 = vmul.f32 %v1497_v26, %v2491_v14 }
 0x7f9   : > { %v1499_v21 = vadd.f32 %v1498_v19, %v2493_v46 }
 0x7fb   : > { %v1500_v23 = vpack.c.bf16 %v1499_v21, %v1499_v21  ;;  %1551 = vst.msk [vmem:[%s2500_s20 + $0x10] sm:$0xff] %vm557_vm0, %v1499_v21 }
 0x7fd   : > { %v1502_v27 = vsel %vm920_vm3, %v1500_v23, 0 }
 0x7fe   : > { %2051 = vmatpush3.bf16.msra.mxu0 %v1502_v27 }
 0x7ff   : > { %2062 = vmatprep.subr.bf16.mxu0 %v2203_v22 }
 0x801   : > { %2053 = vmatmul.mubr.msk.bf16.vlgmr.msra.gmra.mrb[24].mxu0 %vm916_vm4, %v2509_v24 }
 0x802   : > { %2063 = vmatpush3.bf16.msra.mxu0 %v1625_v34  ;;  %2064 = vmatprep.mubr.msk.bf16.mxu0 %vm2204_vm2, %v2203_v22 }
 0x809   : > { %2065 = vmatmul.mubr.msk.bf16.vlgmr.msra.gmra.mrb[28].mxu0 %vm976_vm5, %v2458_v38 }
 0x8d4   : > { %v1538_v28 = vpop.f32.mrb[24].mxu0 }
 0x8d5   : > { %v1539_v9 = vadd.f32 %v1538_v28, %v2532_v29  ;;  %v2054_v3 = vpop.f32.mrb[25].mxu0 }
 0x8d6   : > { %v1541_v15 = vpop.f32.mrb[26].mxu0 }
 0x8d7   : > { %v1929_v30 = vmul.f32 -1.442695, %v1539_v9  ;;  %v2055_v11 = vpop.f32.mrb[27].mxu0 }
 0x8d9   : > { %2170 = vpow2.f32 %v1929_v30 }
 0x8dc   : > { %v1660_v31 = vpop.f32.mrb[28].mxu0 }
 0x8dd   : > { %v1661_v32 = vadd.f32 %v1660_v31, %v2471_v40  ;;  %v2066_v58 = vpop.f32.mrb[29].mxu0 }
 0x8de   : > { %v1663_v57 = vpop.f32.mrb[30].mxu0 }
 0x8df   : > { %v1666_v34 = vadd.f32 %v1661_v32, %v2559_v20  ;;  %v2067_v35 = vpop.f32.mrb[31].mxu0 }
 0x8e1   : > { %v1667_v22 = vsel %vm557_vm0, %v1666_v34, 0.0 }
 0x8e2   : > { %v1668_v36 = vrot.slane %v1667_v22, 4 }
 0x8e3   : > { %v2171_v38 = vpop.eup %2170 }
 0x8e4   : > { %v1547_v39 = vadd.f32 1.0, %v2171_v38  ;;  %v1669_v41 = vadd.f32 %v1668_v36, %v1667_v22 }
 0x8e6   : > { %2172 = vrcp.f32 %v1547_v39  ;;  %v1670_v42 = vrot.slane %v1669_v41, 2 }
 0x8e7   : > { %2174 = vpow2.f32 %v1916_v53  ;;  %v510_v53 = vsub.s32 4, %v2330_v44 }
 0x8e8   : > { %v1671_v45 = vadd.f32 %v1670_v42, %v1669_v41 }
 0x8ea   : > { %v1672_v48 = vrot.slane %v1671_v45, 1 }
 0x8ec   : > { %v1673_v49 = vadd.f32 %v1672_v48, %v1671_v45  ;;  %v1341_v48 = vpop.xlane.xlu0 %1340 }
 0x8ee   : > { %v1674_v50 = vmul.f32 0.125, %v1673_v49 }
 0x8f0   : > { %v2173_v40 = vpop.eup %2172  ;;  %v1675_v51 = vsub.f32 %v1666_v34, %v1674_v50 }
 0x8f1   : > { %v1550_v20 = vmul.f32 %v2173_v40, %v1499_v21  ;;  %v2175_v2 = vpop.eup %2174 }
 0x8f2   : > { %v1676_v55 = vmul.f32 %v1675_v51, %v1675_v51  ;;  %v892_v5 = vadd.f32 1.0, %v2175_v2 }
 0x8f3   : > { %v1552_v56 = vadd.f32 %v1550_v20, %v2405_v62 }
 0x8f4   : > { %v1677_v59 = vsel %vm557_vm0, %v1676_v55, 0.0  ;;  %v514_v55 = vsub.s32 5, %v2330_v44 }
 0x8f5   : > { %v1678_v60 = vrot.slane %v1677_v59, 4  ;;  %v1553_v61 = vsel %vm557_vm0, %v1552_v56, 0.0 }
 0x8f6   : > { %1554 = vadd.xlane.f32.xlu0 %v1553_v61 }
 0x8f7   : > { %v1679_v1 = vadd.f32 %v1678_v60, %v1677_v59 }
 0x8f9   : > { %v1680_v33 = vrot.slane %v1679_v1, 2 }
 0x8fa   : > { %1132 = vadd.xlane.f32.xlu0 %v1131_v17 }
 0x8fb   : > { %v1681_v54 = vadd.f32 %v1680_v33, %v1679_v1 }
 0x8fd   : > { %v1682_v13 = vrot.slane %v1681_v54, 1 }
 0x8ff   : > { %v1683_v25 = vadd.f32 %v1682_v13, %v1681_v54 }
 0x901   : > { %v1684_v62 = vmul.f32 0.125, %v1683_v25 }
 0x903   : > { %v1685_v7 = vadd.f32 1e-05, %v1684_v62  ;;  %v1342_v62 = vmul.f32 0.03125, %v1341_v48 }
 0x905   : > { %2176 = vrsqrt.f32 %v1685_v7  ;;  %v1343_v7 = vsub.f32 %v2586_v18, %v1342_v62 }
 0x906   : > { %2178 = vrcp.f32 %v892_v5 }
 0x90f   : > { %v2177_v6 = vpop.eup %2176 }
 0x910   : > { %v1687_v8 = vmul.f32 %v2177_v6, %v1675_v51  ;;  %v2179_v10 = vpop.eup %2178 }
 0x911   : > { %v904_v12 = vmul.f32 %v2179_v10, %v2407_v63 }
 0x912   : > { %v1688_v16 = vmul.f32 %v1687_v8, %v2482_v37 }
 0x914   : > { %v1689_v26 = vadd.f32 %v1688_v16, %v2484_v43  ;;  %v1344_v16 = vmul.f32 %v1343_v7, %v1343_v7 }
 0x916   : > { %v1690_v19 = vadd.f32 %v1689_v26, %v904_v12 }
 0x918   : > { %v1691_v21 = vsel %vm557_vm0, %v1690_v19, 0.0 }
 0x919   : > { %v1692_v23 = vrot.slane %v1691_v21, 4 }
 0x91b   : > { %v1693_v27 = vadd.f32 %v1692_v23, %v1691_v21 }
 0x91d   : > { %v1694_v28 = vrot.slane %v1693_v27, 2 }
 0x91f   : > { %v1695_v9 = vadd.f32 %v1694_v28, %v1693_v27 }
 0x921   : > { %v1696_v3 = vrot.slane %v1695_v9, 1 }
 0x923   : > { %v1697_v15 = vadd.f32 %v1696_v3, %v1695_v9 }
 0x925   : > { %v1698_v30 = vmul.f32 0.125, %v1697_v15 }
 0x927   : > { %v1699_v11 = vsub.f32 %v1690_v19, %v1698_v30 }
 0x929   : > { %v1700_v31 = vmul.f32 %v1699_v11, %v1699_v11 }
 0x92b   : > { %v1701_v32 = vsel %vm557_vm0, %v1700_v31, 0.0 }
 0x92c   : > { %v1702_v37 = vrot.slane %v1701_v32, 4 }
 0x92e   : > { %v1703_v58 = vadd.f32 %v1702_v37, %v1701_v32 }
 0x930   : > { %v1704_v57 = vrot.slane %v1703_v58, 2 }
 0x932   : > { %v1705_v34 = vadd.f32 %v1704_v57, %v1703_v58 }
 0x934   : > { %v1706_v43 = vrot.slane %v1705_v34, 1 }
 0x936   : > { %v1707_v35 = vadd.f32 %v1706_v43, %v1705_v34 }
 0x938   : > { %v1708_v22 = vmul.f32 0.125, %v1707_v35 }
 0x93a   : > { %v1709_v36 = vadd.f32 1e-05, %v1708_v22 }
 0x93c   : > { %2180 = vrsqrt.f32 %v1709_v36 }
 0x946   : > { %v2181_v38 = vpop.eup %2180 }
 0x947   : > { %v1711_v39 = vmul.f32 %v2181_v38, %v1699_v11 }
 0x949   : > { %v1712_v41 = vmul.f32 %v1711_v39, %v2491_v14 }
 0x94b   : > { %v1713_v42 = vadd.f32 %v1712_v41, %v2493_v46 }
 0x94d   : > { %v1714_v45 = vpack.c.bf16 %v1713_v42, %v1713_v42  ;;  %1765 = vst.msk [vmem:[%s2500_s20 + $0x18] sm:$0xff] %vm557_vm0, %v1713_v42 }
 0x94f   : > { %v1716_v47 = vsel %vm920_vm3, %v1714_v45, 0 }
 0x950   : > { %2069 = vmatpush3.bf16.msra.mxu1 %v1716_v47 }
 0x953   : > { %2071 = vmatmul.mubr.msk.bf16.vlgmr.msra.gmra.mrb[24].mxu1 %vm916_vm4, %v2509_v24  ;;  %v2194_v24 = vld [vmem:[%s2675_s11] sm:$0x3f] }
 0x954   : > { %v511_v59 = vrot.slane %v2194_v24, %v510_v53 }
 0x983   : > { %v1555_v49 = vpop.xlane.xlu0 %1554 }
 0x984   : > { %v1556_v4 = vmul.f32 0.03125, %v1555_v49 }
 0x986   : > { %v1557_v50 = vsub.f32 %v1552_v56, %v1556_v4  ;;  %v515_v56 = vrot.slane %v2194_v24, %v514_v55 }
 0x987   : > { %v1133_v40 = vpop.xlane.xlu0 %1132 }
 0x988   : > { %v1134_v51 = vmul.f32 0.03125, %v1133_v40  ;;  %v1558_v20 = vmul.f32 %v1557_v50, %v1557_v50 }
 0x98a   : > { %v1135_v14 = vadd.f32 1e-05, %v1134_v51  ;;  %v1559_v46 = vsel %vm557_vm0, %v1558_v20, 0.0 }
 0x98b   : > { %1560 = vadd.xlane.f32.xlu0 %v1559_v46 }
 0x98c   : > { %2182 = vrsqrt.f32 %v1135_v14 }
 0x996   : > { %v2183_v60 = vpop.eup %2182 }
 0x997   : > { %v1137_v61 = vmul.f32 %v2183_v60, %v2613_v52 }
 0x999   : > { %v1138_v0 = vmul.f32 %v1137_v61, %v511_v59 }
 0x99b   : > { %v1139_v1 = vadd.f32 %v1138_v0, %v515_v56 }
 0x99d   : > { %1140 = vst.msk [vmem:[%s2645_s28] sm:$0xff] %vm557_vm0, %v1139_v1 }
 0xa18   : > { %v1561_v12 = vpop.xlane.xlu0 %1560 }
 0xa19   : > { %v1562_v26 = vmul.f32 0.03125, %v1561_v12 }
 0xa1b   : > { %v1563_v19 = vadd.f32 1e-05, %v1562_v26 }
 0xa26   : > { %v1752_v44 = vpop.f32.mrb[24].mxu1 }
 0xa27   : > { %v1753_v33 = vadd.f32 %v1752_v44, %v2532_v29  ;;  %v2072_v17 = vpop.f32.mrb[25].mxu1  ;;  %v1345_v29 = vsel %vm557_vm0, %v1344_v16, 0.0 }
 0xa28   : > { %v1755_v54 = vpop.f32.mrb[26].mxu1 }
 0xa29   : > { %v1933_v13 = vmul.f32 -1.442695, %v1753_v33  ;;  %v2073_v25 = vpop.f32.mrb[27].mxu1 }
 0xa2b   : > { %2184 = vpow2.f32 %v1933_v13 }
 0xa35   : > { %v2185_v2 = vpop.eup %2184 }
 0xa36   : > { %v1761_v52 = vadd.f32 1.0, %v2185_v2 }
 0xa38   : > { %2186 = vrcp.f32 %v1761_v52 }
 0xa39   : > { %2188 = vrsqrt.f32 %v1563_v19 }
 0xa42   : > { %v2187_v5 = vpop.eup %2186 }
 0xa43   : > { %v1764_v6 = vmul.f32 %v2187_v5, %v1713_v42  ;;  %v2189_v15 = vpop.eup %2188 }
 0xa44   : > { %v1565_v30 = vmul.f32 %v2189_v15, %v1557_v50 }
 0xa45   : > { %v1766_v8 = vadd.f32 %v1764_v6, %v2407_v63 }
 0xa46   : > { %v1566_v32 = vmul.f32 %v1565_v30, %v511_v59 }
 0xa47   : > { %v1767_v10 = vsel %vm557_vm0, %v1766_v8, 0.0 }
 0xa48   : > { %1768 = vadd.xlane.f32.xlu1 %v1767_v10  ;;  %v1567_v57 = vadd.f32 %v1566_v32, %v515_v56 }
 0xa4a   : > { %1568 = vst.msk [vmem:[%s2645_s28 + $0x10] sm:$0xff] %vm557_vm0, %v1567_v57 }
 0xa4c   : > { %1346 = vadd.xlane.f32.xlu1 %v1345_v29 }
 0xad5   : > { %v1769_v21 = vpop.xlane.xlu1 %1768 }
 0xad6   : > { %v1770_v23 = vmul.f32 0.03125, %v1769_v21 }
 0xad8   : > { %v1771_v27 = vsub.f32 %v1766_v8, %v1770_v23 }
 0xad9   : > { %v1347_v28 = vpop.xlane.xlu1 %1346 }
 0xada   : > { %v1348_v18 = vmul.f32 0.03125, %v1347_v28  ;;  %v1772_v9 = vmul.f32 %v1771_v27, %v1771_v27 }
 0xadc   : > { %v1349_v63 = vadd.f32 1e-05, %v1348_v18  ;;  %v1773_v3 = vsel %vm557_vm0, %v1772_v9, 0.0 }
 0xadd   : > { %1774 = vadd.xlane.f32.xlu1 %v1773_v3 }
 0xade   : > { %2190 = vrsqrt.f32 %v1349_v63 }
 0xae8   : > { %v2191_v11 = vpop.eup %2190 }
 0xae9   : > { %v1351_v31 = vmul.f32 %v2191_v11, %v1343_v7 }
 0xaeb   : > { %v1352_v37 = vmul.f32 %v1351_v31, %v511_v59 }
 0xaed   : > { %v1353_v58 = vadd.f32 %v1352_v37, %v515_v56 }
 0xaef   : > { %1354 = vst.msk [vmem:[%s2645_s28 + $0x8] sm:$0xff] %vm557_vm0, %v1353_v58 }
 0xb6a   : > { %v1775_v34 = vpop.xlane.xlu1 %1774 }
 0xb6b   : > { %v1776_v43 = vmul.f32 0.03125, %v1775_v34 }
 0xb6d   : > { %v1777_v35 = vadd.f32 1e-05, %v1776_v43 }
 0xb6f   : > { %2192 = vrsqrt.f32 %v1777_v35 }
 0xb79   : > { %v2193_v22 = vpop.eup %2192 }
 0xb7a   : > { %v1779_v36 = vmul.f32 %v2193_v22, %v1771_v27 }
 0xb7c   : > { %v1780_v38 = vmul.f32 %v1779_v36, %v511_v59 }
 0xb7e   : > { %v1781_v39 = vadd.f32 %v1780_v38, %v515_v56 }
 0xb80   : > { %1782 = vst.msk [vmem:[%s2645_s28 + $0x18] sm:$0xff] %vm557_vm0, %v1781_v39 }
 0xb81 PF: > { %s24_s25 = sadd.s32 1, %s2201_s25  }
 0xb82   : > { %p21_p4 = scmp.ge.s32.totalorder %s24_s25, 4  }
 0xb84   :  { %23 = sbr.rel (!%p21_p4) target bundleno = 1 (0x1), region = 113 }

</bundles_post_ra>
